<compile_context>
chip_gen: v6e
topology: v6e:2x2x1
jax: 0.10.0
libtpu: 0.0.40
codegen_flags: <defaults>
</compile_context>

<pallas_src>
import jax
import jax.numpy as jnp
from jax.experimental import pallas as pl
from jax.experimental.pallas import tpu as pltpu


def basicnn_kernel(params_ref, x_ref, o_ref):
    # params_ref lives in SMEM: [w00, b00, w01, w10, b10, w11, final_bias]
    w00 = params_ref[0]
    b00 = params_ref[1]
    w01 = params_ref[2]
    w10 = params_ref[3]
    b10 = params_ref[4]
    w11 = params_ref[5]
    final_bias = params_ref[6]

    x = x_ref[...]

    input_to_top_relu = w00 * x + b00
    top_relu_output = jnp.maximum(input_to_top_relu, 0.0)
    scaled_top_relu_output = w01 * top_relu_output

    input_to_bottom_relu = w10 * x + b10
    bottom_relu_output = jnp.maximum(input_to_bottom_relu, 0.0)
    scaled_bottom_relu_output = w11 * bottom_relu_output

    sum_of_scaled_outputs = (
        scaled_top_relu_output + scaled_bottom_relu_output + final_bias
    )
    o_ref[...] = jnp.maximum(sum_of_scaled_outputs, 0.0)


def _round_up(x, m):
    return ((x + m - 1) // m) * m


def basicnn_forward(x, params):
    """x: f32[R, C] (any shape; padded internally). params: f32[7]."""
    R, C = x.shape
    dt_bytes = jnp.dtype(x.dtype).itemsize

    # ---- Tile selection (mem-bound elementwise op) ----------------------
    # Lane-dense column block: full padded width, capped at 2048 columns.
    tc = min(_round_up(C, 128), 2048)
    Cp = _round_up(C, tc)

    # Row block: as many rows as fit a ~4 MiB per-tile budget (so that the
    # double-buffered in+out footprint = 4 * tile stays <= 16 MiB, safe on
    # v5e/v6e and well under v7x's 64 MiB VMEM), capped at 512 rows which is
    # past the measured roofline knee.
    tile_budget_bytes = 4 * 1024 * 1024
    max_rows_by_budget = max(8, (tile_budget_bytes // (tc * dt_bytes)) // 8 * 8)
    tr = min(_round_up(R, 8), 512, max_rows_by_budget)
    Rp = _round_up(R, tr)

    # Keep >=2 grid steps along the (parallel) row axis when the input is big
    # enough, so v7x's two TensorCores both get work.
    if Rp // tr < 2 and Rp >= 16:
        tr = max(8, (Rp // 2) // 8 * 8)
        Rp = _round_up(R, tr)

    # Pad to the block grid; elementwise op, padded region is sliced off.
    if (Rp, Cp) != (R, C):
        xp = jnp.pad(x, ((0, Rp - R), (0, Cp - C)))
    else:
        xp = x

    grid = (Rp // tr, Cp // tc)
    tile_bytes = tr * tc * dt_bytes
    # Explicit scoped-VMEM budget: 2 arrays (in+out) x 2 pipeline buffers x
    # tile_bytes, plus headroom; never above 48 MiB (v7x has 64 MiB total).
    vmem_limit = int(min(4 * tile_bytes + (16 << 20), 48 << 20))

    out = pl.pallas_call(
        basicnn_kernel,
        out_shape=jax.ShapeDtypeStruct((Rp, Cp), x.dtype),
        grid_spec=pltpu.PrefetchScalarGridSpec(
            num_scalar_prefetch=0,
            grid=grid,
            in_specs=[
                pl.BlockSpec(memory_space=pltpu.MemorySpace.SMEM),
                pl.BlockSpec((tr, tc), lambda i, j: (i, j)),
            ],
            out_specs=pl.BlockSpec((tr, tc), lambda i, j: (i, j)),
        ),
        compiler_params=pltpu.CompilerParams(
            dimension_semantics=("parallel", "parallel"),
            vmem_limit_bytes=vmem_limit,
        ),
    )(params, xp)

    return out[:R, :C]


def basicnn_reference(x, params):
    w00, b00, w01, w10, b10, w11, final_bias = [params[i] for i in range(7)]
    top = w01 * jax.nn.relu(w00 * x + b00)
    bot = w11 * jax.nn.relu(w10 * x + b10)
    return jax.nn.relu(top + bot + final_bias)


if __name__ == "__main__":
    # Deterministic parameters matching the PyTorch module's __init__.
    params = jnp.array(
        [1.7, -0.85, -40.8, 12.6, 0.0, 2.7, -16.0], dtype=jnp.float32
    )

    # Small, deliberately non-tile-aligned input to exercise the padding path
    # and the multi-step (parallel) grid. Values in [0, 1] like the classic
    # "dose" input this toy net is usually fed.
    key = jax.random.PRNGKey(0)
    x = jax.random.uniform(key, (300, 520), dtype=jnp.float32)

    out = basicnn_forward(x, params)
    out = jax.block_until_ready(out)

    ref = basicnn_reference(x, params)
    assert out.shape == x.shape and out.dtype == x.dtype
    assert jnp.allclose(out, ref, atol=1e-5, rtol=1e-5)

    print("KERNEL_OK")
</pallas_src>

<mosaic_0001>
module attributes {stable_mosaic.version = 11 : i64} {
  func.func @basicnn_kernel(%arg0: i32, %arg1: i32, %arg2: memref<7xf32, #tpu.memory_space<smem>>, %arg3: memref<152x640xf32, #tpu.memory_space<vmem>>, %arg4: memref<152x640xf32, #tpu.memory_space<vmem>>) attributes {dimension_semantics = [#tpu.dimension_semantics<parallel>, #tpu.dimension_semantics<parallel>], iteration_bounds = array<i64: 2, 1>, scalar_prefetch = 0 : i64, scratch_operands = 0 : i64, tpu.core_type = #tpu.core_type<tc>, window_params = [{transform_indices = @transform_0, window_bounds = array<i64: 7>}, {transform_indices = @transform_1, window_bounds = array<i64: 152, 640>}, {transform_indices = @transform_2, window_bounds = array<i64: 152, 640>}]} {
    %c0 = arith.constant 0 : index
    %0 = memref.load %arg2[%c0] : memref<7xf32, #tpu.memory_space<smem>>
    %c1 = arith.constant 1 : index
    %1 = memref.load %arg2[%c1] : memref<7xf32, #tpu.memory_space<smem>>
    %c2 = arith.constant 2 : index
    %2 = memref.load %arg2[%c2] : memref<7xf32, #tpu.memory_space<smem>>
    %c3 = arith.constant 3 : index
    %3 = memref.load %arg2[%c3] : memref<7xf32, #tpu.memory_space<smem>>
    %c4 = arith.constant 4 : index
    %4 = memref.load %arg2[%c4] : memref<7xf32, #tpu.memory_space<smem>>
    %c5 = arith.constant 5 : index
    %5 = memref.load %arg2[%c5] : memref<7xf32, #tpu.memory_space<smem>>
    %c6 = arith.constant 6 : index
    %6 = memref.load %arg2[%c6] : memref<7xf32, #tpu.memory_space<smem>>
    %c0_0 = arith.constant 0 : index
    %c0_1 = arith.constant 0 : index
    %7 = vector.load %arg3[%c0_0, %c0_1] : memref<152x640xf32, #tpu.memory_space<vmem>>, vector<152x640xf32>
    %8 = vector.broadcast %0 : f32 to vector<152x640xf32>
    %9 = arith.mulf %8, %7 : vector<152x640xf32>
    %10 = vector.broadcast %1 : f32 to vector<152x640xf32>
    %11 = arith.addf %9, %10 : vector<152x640xf32>
    %cst = arith.constant 0.000000e+00 : f32
    %12 = vector.broadcast %cst : f32 to vector<152x640xf32>
    %13 = arith.maximumf %11, %12 : vector<152x640xf32>
    %14 = vector.broadcast %2 : f32 to vector<152x640xf32>
    %15 = arith.mulf %14, %13 : vector<152x640xf32>
    %16 = vector.broadcast %3 : f32 to vector<152x640xf32>
    %17 = arith.mulf %16, %7 : vector<152x640xf32>
    %18 = vector.broadcast %4 : f32 to vector<152x640xf32>
    %19 = arith.addf %17, %18 : vector<152x640xf32>
    %cst_2 = arith.constant 0.000000e+00 : f32
    %20 = vector.broadcast %cst_2 : f32 to vector<152x640xf32>
    %21 = arith.maximumf %19, %20 : vector<152x640xf32>
    %22 = vector.broadcast %5 : f32 to vector<152x640xf32>
    %23 = arith.mulf %22, %21 : vector<152x640xf32>
    %24 = arith.addf %15, %23 : vector<152x640xf32>
    %25 = vector.broadcast %6 : f32 to vector<152x640xf32>
    %26 = arith.addf %24, %25 : vector<152x640xf32>
    %cst_3 = arith.constant 0.000000e+00 : f32
    %27 = vector.broadcast %cst_3 : f32 to vector<152x640xf32>
    %28 = arith.maximumf %26, %27 : vector<152x640xf32>
    %c0_4 = arith.constant 0 : index
    %c0_5 = arith.constant 0 : index
    %29 = vector.load %arg4[%c0_4, %c0_5] : memref<152x640xf32, #tpu.memory_space<vmem>>, vector<152x640xf32>
    tpu.vector_store %arg4[%c0_4, %c0_5], %28 {strides = array<i32>} : memref<152x640xf32, #tpu.memory_space<vmem>>, vector<152x640xf32>,
    return
  }
  func.func @transform_0(%arg0: i32, %arg1: i32) -> i32 {
    %c0_i32 = arith.constant 0 : i32
    %c0_i32_0 = arith.constant 0 : i32
    return %c0_i32 : i32
  }
  func.func @transform_1(%arg0: i32, %arg1: i32) -> (i32, i32) {
    %c0_i32 = arith.constant 0 : i32
    return %arg0, %arg1 : i32, i32
  }
  func.func @transform_2(%arg0: i32, %arg1: i32) -> (i32, i32) {
    %c0_i32 = arith.constant 0 : i32
    return %arg0, %arg1 : i32, i32
  }
}

</mosaic_0001>

<bundles_post_ra>
// kernel: tpu_custom_call.1
= control target key start
LH: loop header
LB: loop body
LE: loop exit
PB: predicated region body
PF: predicated region fallthrough
CT: control target
= control target key end

     0   :  { %7 = vsyncpa [#allocation5], 0  ;;  %s2850_s0 = inlined_call_operand.hbm [shape: f32[7], index: 0, kind: input, shape index: {}]   ;;  %s2851_s1 = inlined_call_operand.hbm [shape: f32[304,640], index: 1, kind: input, shape index: {}]   ;;  %s2852_s2 = inlined_call_operand.hbm [shape: f32[304,640], index: 2, kind: output, shape index: {}]  }
   0x1   :  { %8 = vsyncpa [#allocation3], 0 }
   0x2   :  { %10 = vsyncpa [#allocation3 + $0x1], 0 }
   0x3   :  { %11 = vsyncpa [#allocation4], 0 }
   0x4   :  { %13 = vsyncpa [#allocation4 + $0x1], 0  ;;  %s1809_s9 = smov 0   ;;  %s1811_s10 = smov 0  }
   0x5   :  { %s1813_s11 = smov 0   ;;  %s1815_s12 = smov 0  }
   0x6   :  { %s1817_s13 = smov 0   ;;  %s1819_s14 = smov 0  }
   0x7 LB: > { %s1562_s15 = sadd.s32 4294967295, %s1785_s14   ;;  %s1563_s16 = sadd.s32 4294967294, %s1785_s14   ;;  %s1785_s14 = sphi %s1819_s14, %s19_s14   ;;  %s1781_s13 = sphi %s1817_s13, %s2865_s13   ;;  %s1777_s12 = sphi %s1815_s12, %s2864_s12   ;;  %s1773_s11 = sphi %s1813_s11, %s2863_s11   ;;  %s1769_s10 = sphi %s1811_s10, %s2862_s10   ;;  %s1765_s9 = sphi %s1809_s9, %s2861_s9  }
   0x8   : > { %s61_s17 = sadd.s32 1, %s1773_s11  ;;  %p68_p0 = scmp.ne.s32.totalorder %s1773_s11, %s1769_s10 }
   0x9   : > { %p69_p1 = scmp.eq.s32.totalorder %s1785_s14, 0  ;;  %p74_p2 = scmp.ne.s32.totalorder %s1769_s10, %s1765_s9 }
   0xa   : > { %p1847_p3 = scmp.eq.s32.totalorder %s1562_s15, 0  ;;  %p100_p4 = scmp.eq.s32.totalorder %s1562_s15, 1 }
   0xb   : > { %p70_p5 = por %p69_p1, %p68_p0  ;;  %p106_p6 = scmp.eq.s32.totalorder %s1563_s16, 1 }
   0xc   : > { %p1853_p7 = por %p1847_p3, %p74_p2  ;;  %p1857_p8 = por %p100_p4, %p68_p0 }
   0xd   : > { %p1861_p9 = por %p106_p6, %p74_p2  ;;  %p1564_p10 = scmp.ge.s32.totalorder %s1785_s14, 1 }
   0xe   : > { %p113_p11 = scmp.lt.s32.totalorder %s1785_s14, 3  ;;  %p1604_p1 = scmp.lt.s32.totalorder %s1785_s14, 2 }
   0xf   : > { %s2856_s21 = scalar_select %p1861_p9, 1, 0 }
  0x10   : > { %p1868_p13 = pnand %p1564_p10, %p113_p11  ;;  %s135_s23 = sand.u32 1, %s1773_s11  }
  0x11   : > { %p1876_p2 = pnand %p1604_p1, %p70_p5  ;;  %s31_s25 = sadd.s32 1, %s1781_s13 }
  0x12   : > { %p1591_p0 = pneg %p1868_p13  ;;  %s1579_s26 = smul.u32 760, %s135_s23 }
  0x13   : > { %p33_p6 = scmp.ge.s32.totalorder %s31_s25, 2  ;;  %s1787_s27 = smov [#allocation2]  }
  0x14   : > { %p1592_p4 = pnand %p1591_p0, %p1847_p3  ;;  %s1605_s3 = smul.u32 12160, %s1781_s13 }
  0x15   : > { %s2867_s25 = smov (%p33_p6, %s31_s25), 0  ;;  %s139_s4 = scalar_lea.vmem [#allocation6], %s1579_s26 }
  0x16   : > { %1594 = dma.hbm_to_smem (!%p1592_p4), %s2850_s0, 16, %s1787_s27, [#allocation5]  }
  0x17   : > { %s56_s30 = ssub.s32 %s1781_s13, %s2867_s25  ;;  %s149_s5 = sshll.u32 %s139_s4, 4  ;;  %s150_s5 = int_to_ptr.vmem [resolvable:$true] %s149_s5 }
  0x18   : > { %p59_p5 = scmp.eq.s32.totalorder %s56_s30, 0  ;;  %s148_s8 = scalar_lea.hbm %s2851_s1, %s1605_s3 }
  0x19   : > { %s136_s16 = scalar_lea.sflag [#allocation3], %s135_s23  ;;  %p1675_p10 = pneg %p1876_p2 }
  0x1a   : > { %s1897_s15 = scalar_select %p59_p5, %s1773_s11, %s61_s17  }
  0x1b   : > { %s1686_s27 = scalar_lea.vmem %s150_s5, 12160  ;;  %s1788_s28 = smov [#allocation6]  }
  0x1c   : > { %p1687_p11 = scmp.ne.s32.totalorder %s150_s5, %s1686_s27  ;;  %s1691_s29 = sshll.u32 %s1788_s28, 4  ;;  %s1692_s29 = int_to_ptr.vmem [resolvable:$false] %s1691_s29 }
  0x1d   : > { %s1693_s26 = scalar_lea.vmem %s1692_s29, 24320  ;;  %p1694_p4 = scmp.lt.s32.totalorder %s150_s5, %s1692_s29 }
  0x1e   : > { %p1689_p1 = pnand %p1687_p11, %p1675_p10  ;;  %p1695_p6 = scmp.lt.s32.totalorder %s1693_s26, %s1686_s27 }
  0x20   : > { %p1690_p0 = pneg %p1689_p1  ;;  %p1696_p12 = por %p1695_p6, %p1694_p4 }
  0x22   : > { %p1697_p9 = pnand %p1696_p12, %p1690_p0 }
  0x24   : > { %1700 = shalt.err (!%p1697_p9)
}
  0x25   : > { %s1789_s30 = smov 640   ;;  %s1790_s17 = smov 40  }
  0x26   : > { %1598 = dma.hbm_to_vmem [thread:$0]  (!%p1876_p2), %s148_s8, 12160, %s150_s5, %s136_s16, %s1789_s30, %s1789_s30, %s1790_s17  }
  0x27   : > { %161 = sbr.rel (%p1868_p13) target bundleno = 344 (0x158), region = 28 }
  0x2c   : > { %1752 = dma.done.wait (%p1847_p3), [#allocation5], 16  }
  0x2d   : > { %1754 = vsyncadd (%p1847_p3), [#allocation5], 4294967280  ;;  %s1910_s23 = sand.u32 1, %s1769_s10  }
  0x2e   : > { %s1581_s3 = smul.u32 760, %s1910_s23  ;;  %s168_s4 = scalar_lea.sflag [#allocation3], %s1910_s23 }
  0x30   : > { %s1916_s24 = scalar_lea.vmem [#allocation6], %s1581_s3 }
  0x31   : > { %1756 = dma.done.wait (%p1853_p7), %s168_s4, 12160  }
  0x32   : > { %1758 = vsyncadd (%p1853_p7), %s168_s4, 4294955136 }
  0x33   : > { %176 = sfence }
  0x34   : > { %s197_s18 = sld [smem:[#allocation2]]  ;;  %v204_v0 = vld [vmem:[%s1916_s24] sm:$0xff]  ;;  %v205_v1 = vld [vmem:[%s1916_s24 + $0x8] sm:$0xff]  ;;  %v206_v2 = vld [vmem:[%s1916_s24 + $0x10] sm:$0xff]  ;;  %s1989_s16 = scalar_lea.vmem [#allocation7], %s1581_s3 }
  0x35   : > { %s1570_s22 = sld [smem:[#allocation2 + $0x1]]  ;;  %v207_v3 = vld [vmem:[%s1916_s24 + $0x18] sm:$0xff]  ;;  %v208_v4 = vld [vmem:[%s1916_s24 + $0x20] sm:$0xff]  ;;  %v209_v5 = vld [vmem:[%s1916_s24 + $0x28] sm:$0xff]  ;;  %s1607_s27 = smul.u32 12160, %s1777_s12 }
  0x36   : > { %s1571_s5 = sld [smem:[#allocation2 + $0x2]]  ;;  %v210_v55 = vld [vmem:[%s1916_s24 + $0x30] sm:$0xff]  ;;  %s1463_s28 = sshll.u32 %s1989_s16, 4  ;;  %s2801_s28 = int_to_ptr.vmem [resolvable:$true] %s1463_s28 }
  0x37   : > { %s1572_s6 = sld [smem:[#allocation2 + $0x3]]  ;;  %s2799_s30 = scalar_lea.hbm %s2852_s2, %s1607_s27 }
  0x38   : > { %s1573_s7 = sld [smem:[#allocation2 + $0x4]]  ;;  %s1447_s12 = scalar_lea.sflag [#allocation4], %s1910_s23 }
  0x39   : > { %s1574_s8 = sld [smem:[#allocation2 + $0x5]]  ;;  %s1701_s17 = scalar_lea.vmem %s2801_s28, 12160 }
  0x3a   : > { %s1575_s19 = sld [smem:[#allocation2 + $0x6]]  ;;  %v1928_v6 = vstv %s197_s18  ;;  %p1702_p3 = scmp.ne.s32.totalorder %s2801_s28, %s1701_s17 }
  0x3b   : > { %v300_v7 = vmul.f32 %v1928_v6, %v204_v0  ;;  %v1931_v8 = vstv %s1570_s22  ;;  %v301_v9 = vmul.f32 %v1928_v6, %v205_v1  ;;  %v302_v10 = vmul.f32 %v1928_v6, %v206_v2  ;;  %s1791_s3 = smov [#allocation7]  }
  0x3c   : > { %v1935_v11 = vstv %s1571_s5  ;;  %v303_v12 = vmul.f32 %v1928_v6, %v207_v3  ;;  %v304_v13 = vmul.f32 %v1928_v6, %v208_v4  ;;  %v305_v14 = vmul.f32 %v1928_v6, %v209_v5  ;;  %p1703_p7 = pnand %p1702_p3, %p1857_p8  ;;  %s1705_s4 = sshll.u32 %s1791_s3, 4  ;;  %s1706_s4 = int_to_ptr.vmem [resolvable:$false] %s1705_s4 }
  0x3d   : > { %v396_v15 = vadd.f32 %v1931_v8, %v300_v7  ;;  %v1941_v16 = vstv %s1572_s6  ;;  %v397_v17 = vadd.f32 %v1931_v8, %v301_v9  ;;  %v398_v18 = vadd.f32 %v1931_v8, %v302_v10  ;;  %v212_v7 = vld [vmem:[%s1916_s24 + $0x40] sm:$0xff]  ;;  %p1708_p12 = scmp.lt.s32.totalorder %s2801_s28, %s1706_s4 }
  0x3e   : > { %v683_v19 = vmul.f32 %v1941_v16, %v204_v0  ;;  %v1946_v20 = vstv %s1573_s7  ;;  %v684_v21 = vmul.f32 %v1941_v16, %v205_v1  ;;  %v685_v22 = vmul.f32 %v1941_v16, %v206_v2  ;;  %p1704_p9 = pneg %p1703_p7 }
  0x3f   : > { %v491_v23 = vmax.f32 %v396_v15, 0.0  ;;  %v1950_v24 = vstv %s1574_s8  ;;  %v492_v25 = vmax.f32 %v397_v17, 0.0  ;;  %v493_v26 = vmax.f32 %v398_v18, 0.0 }
  0x40   : > { %v779_v27 = vadd.f32 %v1946_v20, %v683_v19  ;;  %v1953_v28 = vstv %s1575_s19  ;;  %v780_v29 = vadd.f32 %v1946_v20, %v684_v21  ;;  %v781_v30 = vadd.f32 %v1946_v20, %v685_v22 }
  0x41   : > { %v587_v31 = vmul.f32 %v1935_v11, %v491_v23  ;;  %v588_v32 = vmul.f32 %v1935_v11, %v492_v25  ;;  %v589_v33 = vmul.f32 %v1935_v11, %v493_v26  ;;  %v399_v34 = vadd.f32 %v1931_v8, %v303_v12 }
  0x42   : > { %v874_v35 = vmax.f32 %v779_v27, 0.0  ;;  %v875_v36 = vmax.f32 %v780_v29, 0.0  ;;  %v876_v37 = vmax.f32 %v781_v30, 0.0  ;;  %v686_v38 = vmul.f32 %v1941_v16, %v207_v3 }
  0x43   : > { %v494_v39 = vmax.f32 %v399_v34, 0.0  ;;  %v400_v40 = vadd.f32 %v1931_v8, %v304_v13  ;;  %v687_v41 = vmul.f32 %v1941_v16, %v208_v4  ;;  %v401_v42 = vadd.f32 %v1931_v8, %v305_v14  ;;  %v211_v4 = vld [vmem:[%s1916_s24 + $0x38] sm:$0xff] }
  0x44   : > { %v970_v43 = vmul.f32 %v1950_v24, %v874_v35  ;;  %v971_v44 = vmul.f32 %v1950_v24, %v875_v36  ;;  %v972_v45 = vmul.f32 %v1950_v24, %v876_v37  ;;  %v782_v46 = vadd.f32 %v1946_v20, %v686_v38 }
  0x45   : > { %v590_v47 = vmul.f32 %v1935_v11, %v494_v39  ;;  %v495_v48 = vmax.f32 %v400_v40, 0.0  ;;  %v783_v49 = vadd.f32 %v1946_v20, %v687_v41  ;;  %v496_v50 = vmax.f32 %v401_v42, 0.0 }
  0x46   : > { %v1065_v51 = vadd.f32 %v970_v43, %v587_v31  ;;  %v1066_v52 = vadd.f32 %v971_v44, %v588_v32  ;;  %v1067_v53 = vadd.f32 %v972_v45, %v589_v33  ;;  %v877_v54 = vmax.f32 %v782_v46, 0.0  ;;  %v213_v33 = vld [vmem:[%s1916_s24 + $0x48] sm:$0xff]  ;;  %v214_v46 = vld [vmem:[%s1916_s24 + $0x50] sm:$0xff] }
  0x47   : > { %v591_v56 = vmul.f32 %v1935_v11, %v495_v48  ;;  %v878_v57 = vmax.f32 %v783_v49, 0.0  ;;  %v592_v58 = vmul.f32 %v1935_v11, %v496_v50  ;;  %v688_v59 = vmul.f32 %v1941_v16, %v209_v5 }
  0x48   : > { %v1161_v60 = vadd.f32 %v1953_v28, %v1065_v51  ;;  %v1162_v61 = vadd.f32 %v1953_v28, %v1066_v52  ;;  %v1163_v62 = vadd.f32 %v1953_v28, %v1067_v53  ;;  %v973_v63 = vmul.f32 %v1950_v24, %v877_v54  ;;  %v215_v51 = vld [vmem:[%s1916_s24 + $0x58] sm:$0xff] }
  0x49   : > { %v974_v0 = vmul.f32 %v1950_v24, %v878_v57  ;;  %v784_v1 = vadd.f32 %v1946_v20, %v688_v59  ;;  %v306_v2 = vmul.f32 %v1928_v6, %v210_v55  ;;  %v689_v3 = vmul.f32 %v1941_v16, %v210_v55 }
  0x4a   : > { %v1256_v5 = vmax.f32 %v1161_v60, 0.0  ;;  %v1257_v9 = vmax.f32 %v1162_v61, 0.0  ;;  %v1258_v10 = vmax.f32 %v1163_v62, 0.0  ;;  %v1068_v12 = vadd.f32 %v973_v63, %v590_v47 }
  0x4b   : > { %v1069_v13 = vadd.f32 %v974_v0, %v591_v56  ;;  %v879_v14 = vmax.f32 %v784_v1, 0.0  ;;  %v402_v15 = vadd.f32 %v1931_v8, %v306_v2  ;;  %v785_v17 = vadd.f32 %v1946_v20, %v689_v3 }
  0x4c   : > { %1351 = vst [vmem:[%s1989_s16] sm:$0xff] %v1256_v5  ;;  %1352 = vst [vmem:[%s1989_s16 + $0x8] sm:$0xff] %v1257_v9  ;;  %v1164_v18 = vadd.f32 %v1953_v28, %v1068_v12  ;;  %v307_v19 = vmul.f32 %v1928_v6, %v211_v4  ;;  %v690_v21 = vmul.f32 %v1941_v16, %v211_v4  ;;  %v216_v4 = vld [vmem:[%s1916_s24 + $0x60] sm:$0xff] }
  0x4d   : > { %1353 = vst [vmem:[%s1989_s16 + $0x10] sm:$0xff] %v1258_v10  ;;  %v308_v22 = vmul.f32 %v1928_v6, %v212_v7  ;;  %v1165_v23 = vadd.f32 %v1953_v28, %v1069_v13  ;;  %v975_v25 = vmul.f32 %v1950_v24, %v879_v14  ;;  %v497_v26 = vmax.f32 %v402_v15, 0.0 }
  0x4e   : > { %v880_v27 = vmax.f32 %v785_v17, 0.0  ;;  %v1259_v29 = vmax.f32 %v1164_v18, 0.0  ;;  %v403_v30 = vadd.f32 %v1931_v8, %v307_v19  ;;  %v786_v31 = vadd.f32 %v1946_v20, %v690_v21 }
  0x4f   : > { %v404_v32 = vadd.f32 %v1931_v8, %v308_v22  ;;  %v1260_v34 = vmax.f32 %v1165_v23, 0.0  ;;  %v1070_v35 = vadd.f32 %v975_v25, %v592_v58  ;;  %v593_v36 = vmul.f32 %v1935_v11, %v497_v26  ;;  %v217_v22 = vld [vmem:[%s1916_s24 + $0x68] sm:$0xff] }
  0x50   : > { %v976_v37 = vmul.f32 %v1950_v24, %v880_v27  ;;  %1354 = vst [vmem:[%s1989_s16 + $0x18] sm:$0xff] %v1259_v29  ;;  %v498_v38 = vmax.f32 %v403_v30, 0.0  ;;  %v881_v39 = vmax.f32 %v786_v31, 0.0  ;;  %v691_v41 = vmul.f32 %v1941_v16, %v212_v7 }
  0x51   : > { %v499_v40 = vmax.f32 %v404_v32, 0.0  ;;  %1355 = vst [vmem:[%s1989_s16 + $0x20] sm:$0xff] %v1260_v34  ;;  %v1166_v42 = vadd.f32 %v1953_v28, %v1070_v35  ;;  %v309_v44 = vmul.f32 %v1928_v6, %v213_v33  ;;  %v692_v45 = vmul.f32 %v1941_v16, %v213_v33  ;;  %v218_v33 = vld [vmem:[%s1916_s24 + $0x70] sm:$0xff] }
  0x52   : > { %v1071_v43 = vadd.f32 %v976_v37, %v593_v36  ;;  %v594_v47 = vmul.f32 %v1935_v11, %v498_v38  ;;  %v977_v48 = vmul.f32 %v1950_v24, %v881_v39  ;;  %v787_v50 = vadd.f32 %v1946_v20, %v691_v41 }
  0x53   : > { %v595_v49 = vmul.f32 %v1935_v11, %v499_v40  ;;  %v1261_v52 = vmax.f32 %v1166_v42, 0.0  ;;  %v405_v54 = vadd.f32 %v1931_v8, %v309_v44  ;;  %v788_v55 = vadd.f32 %v1946_v20, %v692_v45 }
  0x54   : > { %v1167_v53 = vadd.f32 %v1953_v28, %v1071_v43  ;;  %v1072_v56 = vadd.f32 %v977_v48, %v594_v47  ;;  %v882_v57 = vmax.f32 %v787_v50, 0.0  ;;  %v310_v58 = vmul.f32 %v1928_v6, %v214_v46 }
  0x55   : > { %v693_v59 = vmul.f32 %v1941_v16, %v214_v46  ;;  %1356 = vst [vmem:[%s1989_s16 + $0x28] sm:$0xff] %v1261_v52  ;;  %v500_v61 = vmax.f32 %v405_v54, 0.0  ;;  %v883_v62 = vmax.f32 %v788_v55, 0.0  ;;  %v311_v63 = vmul.f32 %v1928_v6, %v215_v51  ;;  %v219_v46 = vld [vmem:[%s1916_s24 + $0x78] sm:$0xff] }
  0x56   : > { %v1262_v60 = vmax.f32 %v1167_v53, 0.0  ;;  %v1168_v0 = vadd.f32 %v1953_v28, %v1072_v56  ;;  %v978_v1 = vmul.f32 %v1950_v24, %v882_v57  ;;  %v406_v2 = vadd.f32 %v1931_v8, %v310_v58 }
  0x57   : > { %v789_v3 = vadd.f32 %v1946_v20, %v693_v59  ;;  %v596_v7 = vmul.f32 %v1935_v11, %v500_v61  ;;  %v979_v5 = vmul.f32 %v1950_v24, %v883_v62  ;;  %v407_v9 = vadd.f32 %v1931_v8, %v311_v63  ;;  %v220_v59 = vld [vmem:[%s1916_s24 + $0x80] sm:$0xff] }
  0x58   : > { %1357 = vst [vmem:[%s1989_s16 + $0x30] sm:$0xff] %v1262_v60  ;;  %v694_v10 = vmul.f32 %v1941_v16, %v215_v51  ;;  %v1263_v12 = vmax.f32 %v1168_v0, 0.0  ;;  %v1073_v13 = vadd.f32 %v978_v1, %v595_v49  ;;  %v501_v14 = vmax.f32 %v406_v2, 0.0 }
  0x59   : > { %v884_v15 = vmax.f32 %v789_v3, 0.0  ;;  %v1074_v17 = vadd.f32 %v979_v5, %v596_v7  ;;  %v502_v18 = vmax.f32 %v407_v9, 0.0  ;;  %v312_v21 = vmul.f32 %v1928_v6, %v216_v4 }
  0x5a   : > { %v790_v19 = vadd.f32 %v1946_v20, %v694_v10  ;;  %1358 = vst [vmem:[%s1989_s16 + $0x38] sm:$0xff] %v1263_v12  ;;  %v1169_v23 = vadd.f32 %v1953_v28, %v1073_v13  ;;  %v597_v25 = vmul.f32 %v1935_v11, %v501_v14  ;;  %v695_v27 = vmul.f32 %v1941_v16, %v216_v4  ;;  %v221_v4 = vld [vmem:[%s1916_s24 + $0x88] sm:$0xff] }
  0x5b   : > { %v980_v26 = vmul.f32 %v1950_v24, %v884_v15  ;;  %v1170_v29 = vadd.f32 %v1953_v28, %v1074_v17  ;;  %v598_v30 = vmul.f32 %v1935_v11, %v502_v18  ;;  %v408_v32 = vadd.f32 %v1931_v8, %v312_v21 }
  0x5c   : > { %v885_v31 = vmax.f32 %v790_v19, 0.0  ;;  %v1264_v34 = vmax.f32 %v1169_v23, 0.0  ;;  %v791_v36 = vadd.f32 %v1946_v20, %v695_v27  ;;  %v313_v37 = vmul.f32 %v1928_v6, %v217_v22 }
  0x5d   : > { %v1075_v35 = vadd.f32 %v980_v26, %v597_v25  ;;  %v1265_v38 = vmax.f32 %v1170_v29, 0.0  ;;  %v503_v40 = vmax.f32 %v408_v32, 0.0  ;;  %v696_v41 = vmul.f32 %v1941_v16, %v217_v22  ;;  %v222_v22 = vld [vmem:[%s1916_s24 + $0x90] sm:$0xff] }
  0x5e   : > { %v981_v39 = vmul.f32 %v1950_v24, %v885_v31  ;;  %1359 = vst [vmem:[%s1989_s16 + $0x40] sm:$0xff] %v1264_v34  ;;  %v886_v43 = vmax.f32 %v791_v36, 0.0  ;;  %v409_v44 = vadd.f32 %v1931_v8, %v313_v37  ;;  %v314_v45 = vmul.f32 %v1928_v6, %v218_v33  ;;  %v223_v37 = vld [vmem:[%s1916_s24 + $0x98] sm:$0xff] }
  0x5f   : > { %v1171_v42 = vadd.f32 %v1953_v28, %v1075_v35  ;;  %1360 = vst [vmem:[%s1989_s16 + $0x48] sm:$0xff] %v1265_v38  ;;  %v599_v48 = vmul.f32 %v1935_v11, %v503_v40  ;;  %v792_v49 = vadd.f32 %v1946_v20, %v696_v41  ;;  %v697_v50 = vmul.f32 %v1941_v16, %v218_v33 }
  0x60   : > { %v1076_v47 = vadd.f32 %v981_v39, %v598_v30  ;;  %v982_v52 = vmul.f32 %v1950_v24, %v886_v43  ;;  %v504_v53 = vmax.f32 %v409_v44, 0.0  ;;  %v410_v54 = vadd.f32 %v1931_v8, %v314_v45 }
  0x61   : > { %v1266_v51 = vmax.f32 %v1171_v42, 0.0  ;;  %v887_v56 = vmax.f32 %v792_v49, 0.0  ;;  %v793_v57 = vadd.f32 %v1946_v20, %v697_v50  ;;  %v315_v58 = vmul.f32 %v1928_v6, %v219_v46 }
  0x62   : > { %v1172_v55 = vadd.f32 %v1953_v28, %v1076_v47  ;;  %v1077_v60 = vadd.f32 %v982_v52, %v599_v48  ;;  %v600_v61 = vmul.f32 %v1935_v11, %v504_v53  ;;  %v505_v62 = vmax.f32 %v410_v54, 0.0 }
  0x63   : > { %1361 = vst [vmem:[%s1989_s16 + $0x50] sm:$0xff] %v1266_v51  ;;  %v698_v63 = vmul.f32 %v1941_v16, %v219_v46  ;;  %v983_v1 = vmul.f32 %v1950_v24, %v887_v56  ;;  %v888_v2 = vmax.f32 %v793_v57, 0.0  ;;  %v411_v3 = vadd.f32 %v1931_v8, %v315_v58  ;;  %v224_v46 = vld [vmem:[%s1916_s24 + $0xa0] sm:$0xff] }
  0x64   : > { %v1267_v0 = vmax.f32 %v1172_v55, 0.0  ;;  %v1173_v7 = vadd.f32 %v1953_v28, %v1077_v60  ;;  %v601_v5 = vmul.f32 %v1935_v11, %v505_v62  ;;  %v316_v10 = vmul.f32 %v1928_v6, %v220_v59 }
  0x65   : > { %v794_v9 = vadd.f32 %v1946_v20, %v698_v63  ;;  %v1078_v12 = vadd.f32 %v983_v1, %v600_v61  ;;  %v984_v13 = vmul.f32 %v1950_v24, %v888_v2  ;;  %v506_v14 = vmax.f32 %v411_v3, 0.0 }
  0x66   : > { %1362 = vst [vmem:[%s1989_s16 + $0x58] sm:$0xff] %v1267_v0  ;;  %v699_v15 = vmul.f32 %v1941_v16, %v220_v59  ;;  %v1268_v17 = vmax.f32 %v1173_v7, 0.0  ;;  %v412_v19 = vadd.f32 %v1931_v8, %v316_v10  ;;  %v317_v21 = vmul.f32 %v1928_v6, %v221_v4  ;;  %v225_v59 = vld [vmem:[%s1916_s24 + $0xa8] sm:$0xff]  ;;  %v226_v10 = vld [vmem:[%s1916_s24 + $0xb0] sm:$0xff] }
  0x67   : > { %v889_v18 = vmax.f32 %v794_v9, 0.0  ;;  %v1174_v23 = vadd.f32 %v1953_v28, %v1078_v12  ;;  %v1079_v25 = vadd.f32 %v984_v13, %v601_v5  ;;  %v602_v26 = vmul.f32 %v1935_v11, %v506_v14 }
  0x68   : > { %v795_v27 = vadd.f32 %v1946_v20, %v699_v15  ;;  %1363 = vst [vmem:[%s1989_s16 + $0x60] sm:$0xff] %v1268_v17  ;;  %v507_v30 = vmax.f32 %v412_v19, 0.0  ;;  %v413_v31 = vadd.f32 %v1931_v8, %v317_v21  ;;  %v700_v32 = vmul.f32 %v1941_v16, %v221_v4 }
  0x69   : > { %v985_v29 = vmul.f32 %v1950_v24, %v889_v18  ;;  %v1269_v33 = vmax.f32 %v1174_v23, 0.0  ;;  %v1175_v34 = vadd.f32 %v1953_v28, %v1079_v25  ;;  %v318_v36 = vmul.f32 %v1928_v6, %v222_v22 }
  0x6a   : > { %v890_v35 = vmax.f32 %v795_v27, 0.0  ;;  %v603_v39 = vmul.f32 %v1935_v11, %v507_v30  ;;  %v508_v40 = vmax.f32 %v413_v31, 0.0  ;;  %v796_v41 = vadd.f32 %v1946_v20, %v700_v32 }
  0x6b   : > { %v1080_v38 = vadd.f32 %v985_v29, %v602_v26  ;;  %1364 = vst [vmem:[%s1989_s16 + $0x68] sm:$0xff] %v1269_v33  ;;  %v1270_v42 = vmax.f32 %v1175_v34, 0.0  ;;  %v414_v44 = vadd.f32 %v1931_v8, %v318_v36  ;;  %v701_v45 = vmul.f32 %v1941_v16, %v222_v22  ;;  %v227_v22 = vld [vmem:[%s1916_s24 + $0xb8] sm:$0xff] }
  0x6c   : > { %v986_v43 = vmul.f32 %v1950_v24, %v890_v35  ;;  %v604_v48 = vmul.f32 %v1935_v11, %v508_v40  ;;  %v891_v49 = vmax.f32 %v796_v41, 0.0  ;;  %v319_v50 = vmul.f32 %v1928_v6, %v223_v37 }
  0x6d   : > { %v1176_v47 = vadd.f32 %v1953_v28, %v1080_v38  ;;  %1365 = vst [vmem:[%s1989_s16 + $0x70] sm:$0xff] %v1270_v42  ;;  %v509_v52 = vmax.f32 %v414_v44, 0.0  ;;  %v797_v53 = vadd.f32 %v1946_v20, %v701_v45  ;;  %v702_v54 = vmul.f32 %v1941_v16, %v223_v37  ;;  %v228_v37 = vld [vmem:[%s1916_s24 + $0xc0] sm:$0xff] }
  0x6e   : > { %v1081_v51 = vadd.f32 %v986_v43, %v603_v39  ;;  %v987_v56 = vmul.f32 %v1950_v24, %v891_v49  ;;  %v415_v57 = vadd.f32 %v1931_v8, %v319_v50  ;;  %v320_v58 = vmul.f32 %v1928_v6, %v224_v46  ;;  %v229_v50 = vld [vmem:[%s1916_s24 + $0xc8] sm:$0xff] }
  0x6f   : > { %v1271_v55 = vmax.f32 %v1176_v47, 0.0  ;;  %v605_v61 = vmul.f32 %v1935_v11, %v509_v52  ;;  %v892_v62 = vmax.f32 %v797_v53, 0.0  ;;  %v798_v63 = vadd.f32 %v1946_v20, %v702_v54 }
  0x70   : > { %v1177_v60 = vadd.f32 %v1953_v28, %v1081_v51  ;;  %v1082_v0 = vadd.f32 %v987_v56, %v604_v48  ;;  %v510_v1 = vmax.f32 %v415_v57, 0.0  ;;  %v416_v2 = vadd.f32 %v1931_v8, %v320_v58 }
  0x71   : > { %1366 = vst [vmem:[%s1989_s16 + $0x78] sm:$0xff] %v1271_v55  ;;  %v703_v3 = vmul.f32 %v1941_v16, %v224_v46  ;;  %v988_v7 = vmul.f32 %v1950_v24, %v892_v62  ;;  %v893_v5 = vmax.f32 %v798_v63, 0.0  ;;  %v321_v9 = vmul.f32 %v1928_v6, %v225_v59 }
  0x72   : > { %v1272_v4 = vmax.f32 %v1177_v60, 0.0  ;;  %v1178_v12 = vadd.f32 %v1953_v28, %v1082_v0  ;;  %v606_v13 = vmul.f32 %v1935_v11, %v510_v1  ;;  %v511_v14 = vmax.f32 %v416_v2, 0.0 }
  0x73   : > { %v799_v15 = vadd.f32 %v1946_v20, %v703_v3  ;;  %v1083_v17 = vadd.f32 %v988_v7, %v605_v61  ;;  %v989_v18 = vmul.f32 %v1950_v24, %v893_v5  ;;  %v417_v19 = vadd.f32 %v1931_v8, %v321_v9 }
  0x74   : > { %1367 = vst [vmem:[%s1989_s16 + $0x80] sm:$0xff] %v1272_v4  ;;  %v704_v21 = vmul.f32 %v1941_v16, %v225_v59  ;;  %v1273_v23 = vmax.f32 %v1178_v12, 0.0  ;;  %v607_v25 = vmul.f32 %v1935_v11, %v511_v14  ;;  %v322_v27 = vmul.f32 %v1928_v6, %v226_v10  ;;  %v230_v59 = vld [vmem:[%s1916_s24 + $0xd0] sm:$0xff] }
  0x75   : > { %v894_v26 = vmax.f32 %v799_v15, 0.0  ;;  %v1179_v29 = vadd.f32 %v1953_v28, %v1083_v17  ;;  %v1084_v30 = vadd.f32 %v989_v18, %v606_v13  ;;  %v512_v31 = vmax.f32 %v417_v19, 0.0 }
  0x76   : > { %v800_v32 = vadd.f32 %v1946_v20, %v704_v21  ;;  %1368 = vst [vmem:[%s1989_s16 + $0x88] sm:$0xff] %v1273_v23  ;;  %v418_v34 = vadd.f32 %v1931_v8, %v322_v27  ;;  %v705_v35 = vmul.f32 %v1941_v16, %v226_v10  ;;  %v323_v36 = vmul.f32 %v1928_v6, %v227_v22  ;;  %v231_v10 = vld [vmem:[%s1916_s24 + $0xd8] sm:$0xff]  ;;  %v232_v27 = vld [vmem:[%s1916_s24 + $0xe0] sm:$0xff] }
  0x77   : > { %v990_v33 = vmul.f32 %v1950_v24, %v894_v26  ;;  %v1274_v38 = vmax.f32 %v1179_v29, 0.0  ;;  %v1180_v39 = vadd.f32 %v1953_v28, %v1084_v30  ;;  %v608_v40 = vmul.f32 %v1935_v11, %v512_v31 }
  0x78   : > { %v895_v41 = vmax.f32 %v800_v32, 0.0  ;;  %v513_v43 = vmax.f32 %v418_v34, 0.0  ;;  %v801_v44 = vadd.f32 %v1946_v20, %v705_v35  ;;  %v419_v45 = vadd.f32 %v1931_v8, %v323_v36 }
  0x79   : > { %v1085_v42 = vadd.f32 %v990_v33, %v607_v25  ;;  %1369 = vst [vmem:[%s1989_s16 + $0x90] sm:$0xff] %v1274_v38  ;;  %v1275_v46 = vmax.f32 %v1180_v39, 0.0  ;;  %v706_v48 = vmul.f32 %v1941_v16, %v227_v22  ;;  %v324_v49 = vmul.f32 %v1928_v6, %v228_v37 }
  0x7a   : > { %v991_v47 = vmul.f32 %v1950_v24, %v895_v41  ;;  %v609_v52 = vmul.f32 %v1935_v11, %v513_v43  ;;  %v896_v53 = vmax.f32 %v801_v44, 0.0  ;;  %v514_v54 = vmax.f32 %v419_v45, 0.0  ;;  %v233_v41 = vld [vmem:[%s1916_s24 + $0xe8] sm:$0xff] }
  0x7b   : > { %v1181_v51 = vadd.f32 %v1953_v28, %v1085_v42  ;;  %1370 = vst [vmem:[%s1989_s16 + $0x98] sm:$0xff] %v1275_v46  ;;  %v802_v56 = vadd.f32 %v1946_v20, %v706_v48  ;;  %v420_v57 = vadd.f32 %v1931_v8, %v324_v49  ;;  %v707_v58 = vmul.f32 %v1941_v16, %v228_v37 }
  0x7c   : > { %v1086_v55 = vadd.f32 %v991_v47, %v608_v40  ;;  %v992_v61 = vmul.f32 %v1950_v24, %v896_v53  ;;  %v610_v62 = vmul.f32 %v1935_v11, %v514_v54  ;;  %v325_v63 = vmul.f32 %v1928_v6, %v229_v50 }
  0x7d   : > { %v1276_v60 = vmax.f32 %v1181_v51, 0.0  ;;  %v897_v1 = vmax.f32 %v802_v56, 0.0  ;;  %v515_v2 = vmax.f32 %v420_v57, 0.0  ;;  %v803_v3 = vadd.f32 %v1946_v20, %v707_v58 }
  0x7e   : > { %v1182_v0 = vadd.f32 %v1953_v28, %v1086_v55  ;;  %v1087_v4 = vadd.f32 %v992_v61, %v609_v52  ;;  %v421_v7 = vadd.f32 %v1931_v8, %v325_v63  ;;  %v708_v5 = vmul.f32 %v1941_v16, %v229_v50  ;;  %v234_v50 = vld [vmem:[%s1916_s24 + $0xf0] sm:$0xff]  ;;  %v235_v63 = vld [vmem:[%s1916_s24 + $0xf8] sm:$0xff] }
  0x7f   : > { %1371 = vst [vmem:[%s1989_s16 + $0xa0] sm:$0xff] %v1276_v60  ;;  %v326_v9 = vmul.f32 %v1928_v6, %v230_v59  ;;  %v993_v13 = vmul.f32 %v1950_v24, %v897_v1  ;;  %v611_v14 = vmul.f32 %v1935_v11, %v515_v2  ;;  %v898_v15 = vmax.f32 %v803_v3, 0.0 }
  0x80   : > { %v1277_v12 = vmax.f32 %v1182_v0, 0.0  ;;  %v1183_v17 = vadd.f32 %v1953_v28, %v1087_v4  ;;  %v516_v18 = vmax.f32 %v421_v7, 0.0  ;;  %v804_v19 = vadd.f32 %v1946_v20, %v708_v5 }
  0x81   : > { %v422_v21 = vadd.f32 %v1931_v8, %v326_v9  ;;  %v1088_v22 = vadd.f32 %v993_v13, %v610_v62  ;;  %v994_v23 = vmul.f32 %v1950_v24, %v898_v15  ;;  %v709_v25 = vmul.f32 %v1941_v16, %v230_v59  ;;  %v236_v15 = vld [vmem:[%s1916_s24 + $0x100] sm:$0xff] }
  0x82   : > { %1372 = vst [vmem:[%s1989_s16 + $0xa8] sm:$0xff] %v1277_v12  ;;  %v327_v26 = vmul.f32 %v1928_v6, %v231_v10  ;;  %v1278_v29 = vmax.f32 %v1183_v17, 0.0  ;;  %v612_v30 = vmul.f32 %v1935_v11, %v516_v18  ;;  %v899_v31 = vmax.f32 %v804_v19, 0.0 }
  0x83   : > { %v517_v32 = vmax.f32 %v422_v21, 0.0  ;;  %v1184_v33 = vadd.f32 %v1953_v28, %v1088_v22  ;;  %v1089_v34 = vadd.f32 %v994_v23, %v611_v14  ;;  %v805_v35 = vadd.f32 %v1946_v20, %v709_v25 }
  0x84   : > { %v423_v36 = vadd.f32 %v1931_v8, %v327_v26  ;;  %1373 = vst [vmem:[%s1989_s16 + $0xb0] sm:$0xff] %v1278_v29  ;;  %v995_v37 = vmul.f32 %v1950_v24, %v899_v31  ;;  %v710_v39 = vmul.f32 %v1941_v16, %v231_v10  ;;  %v328_v40 = vmul.f32 %v1928_v6, %v232_v27 }
  0x85   : > { %v613_v38 = vmul.f32 %v1935_v11, %v517_v32  ;;  %v1279_v42 = vmax.f32 %v1184_v33, 0.0  ;;  %v1185_v43 = vadd.f32 %v1953_v28, %v1089_v34  ;;  %v900_v44 = vmax.f32 %v805_v35, 0.0  ;;  %v237_v32 = vld [vmem:[%s1916_s24 + $0x108] sm:$0xff] }
  0x86   : > { %v518_v45 = vmax.f32 %v423_v36, 0.0  ;;  %v1090_v46 = vadd.f32 %v995_v37, %v612_v30  ;;  %v806_v47 = vadd.f32 %v1946_v20, %v710_v39  ;;  %v424_v48 = vadd.f32 %v1931_v8, %v328_v40 }
  0x87   : > { %v711_v49 = vmul.f32 %v1941_v16, %v232_v27  ;;  %1374 = vst [vmem:[%s1989_s16 + $0xb8] sm:$0xff] %v1279_v42  ;;  %v1280_v51 = vmax.f32 %v1185_v43, 0.0  ;;  %v996_v52 = vmul.f32 %v1950_v24, %v900_v44  ;;  %v329_v54 = vmul.f32 %v1928_v6, %v233_v41 }
  0x88   : > { %v614_v53 = vmul.f32 %v1935_v11, %v518_v45  ;;  %v1186_v55 = vadd.f32 %v1953_v28, %v1090_v46  ;;  %v901_v56 = vmax.f32 %v806_v47, 0.0  ;;  %v519_v57 = vmax.f32 %v424_v48, 0.0 }
  0x89   : > { %v807_v58 = vadd.f32 %v1946_v20, %v711_v49  ;;  %1375 = vst [vmem:[%s1989_s16 + $0xc0] sm:$0xff] %v1280_v51  ;;  %v1091_v59 = vadd.f32 %v996_v52, %v613_v38  ;;  %v425_v60 = vadd.f32 %v1931_v8, %v329_v54  ;;  %v712_v61 = vmul.f32 %v1941_v16, %v233_v41  ;;  %v238_v41 = vld [vmem:[%s1916_s24 + $0x110] sm:$0xff]  ;;  %v239_v54 = vld [vmem:[%s1916_s24 + $0x118] sm:$0xff] }
  0x8a   : > { %v330_v62 = vmul.f32 %v1928_v6, %v234_v50  ;;  %v1281_v0 = vmax.f32 %v1186_v55, 0.0  ;;  %v997_v1 = vmul.f32 %v1950_v24, %v901_v56  ;;  %v615_v2 = vmul.f32 %v1935_v11, %v519_v57 }
  0x8b   : > { %v902_v3 = vmax.f32 %v807_v58, 0.0  ;;  %v1187_v4 = vadd.f32 %v1953_v28, %v1091_v59  ;;  %v520_v7 = vmax.f32 %v425_v60, 0.0  ;;  %v808_v5 = vadd.f32 %v1946_v20, %v712_v61 }
  0x8c   : > { %v426_v9 = vadd.f32 %v1931_v8, %v330_v62  ;;  %1376 = vst [vmem:[%s1989_s16 + $0xc8] sm:$0xff] %v1281_v0  ;;  %v1092_v10 = vadd.f32 %v997_v1, %v614_v53  ;;  %v713_v13 = vmul.f32 %v1941_v16, %v234_v50  ;;  %v331_v14 = vmul.f32 %v1928_v6, %v235_v63 }
  0x8d   : > { %v998_v12 = vmul.f32 %v1950_v24, %v902_v3  ;;  %v1282_v17 = vmax.f32 %v1187_v4, 0.0  ;;  %v616_v18 = vmul.f32 %v1935_v11, %v520_v7  ;;  %v903_v19 = vmax.f32 %v808_v5, 0.0  ;;  %v240_v3 = vld [vmem:[%s1916_s24 + $0x120] sm:$0xff] }
  0x8e   : > { %v521_v21 = vmax.f32 %v426_v9, 0.0  ;;  %v1188_v22 = vadd.f32 %v1953_v28, %v1092_v10  ;;  %v809_v25 = vadd.f32 %v1946_v20, %v713_v13  ;;  %v427_v26 = vadd.f32 %v1931_v8, %v331_v14 }
  0x8f   : > { %v1093_v23 = vadd.f32 %v998_v12, %v615_v2  ;;  %1377 = vst [vmem:[%s1989_s16 + $0xd0] sm:$0xff] %v1282_v17  ;;  %v999_v27 = vmul.f32 %v1950_v24, %v903_v19  ;;  %v714_v30 = vmul.f32 %v1941_v16, %v235_v63  ;;  %v332_v31 = vmul.f32 %v1928_v6, %v236_v15 }
  0x90   : > { %v617_v29 = vmul.f32 %v1935_v11, %v521_v21  ;;  %v1283_v33 = vmax.f32 %v1188_v22, 0.0  ;;  %v904_v35 = vmax.f32 %v809_v25, 0.0  ;;  %v522_v36 = vmax.f32 %v427_v26, 0.0  ;;  %v241_v21 = vld [vmem:[%s1916_s24 + $0x128] sm:$0xff] }
  0x91   : > { %v1189_v34 = vadd.f32 %v1953_v28, %v1093_v23  ;;  %v1094_v37 = vadd.f32 %v999_v27, %v616_v18  ;;  %v810_v38 = vadd.f32 %v1946_v20, %v714_v30  ;;  %v428_v39 = vadd.f32 %v1931_v8, %v332_v31 }
  0x92   : > { %v715_v40 = vmul.f32 %v1941_v16, %v236_v15  ;;  %1378 = vst [vmem:[%s1989_s16 + $0xd8] sm:$0xff] %v1283_v33  ;;  %v1000_v43 = vmul.f32 %v1950_v24, %v904_v35  ;;  %v618_v44 = vmul.f32 %v1935_v11, %v522_v36  ;;  %v333_v45 = vmul.f32 %v1928_v6, %v237_v32 }
  0x93   : > { %v1284_v42 = vmax.f32 %v1189_v34, 0.0  ;;  %v1190_v46 = vadd.f32 %v1953_v28, %v1094_v37  ;;  %v905_v47 = vmax.f32 %v810_v38, 0.0  ;;  %v523_v48 = vmax.f32 %v428_v39, 0.0 }
  0x94   : > { %v811_v49 = vadd.f32 %v1946_v20, %v715_v40  ;;  %v1095_v50 = vadd.f32 %v1000_v43, %v617_v29  ;;  %v429_v51 = vadd.f32 %v1931_v8, %v333_v45  ;;  %v716_v52 = vmul.f32 %v1941_v16, %v237_v32  ;;  %v242_v32 = vld [vmem:[%s1916_s24 + $0x130] sm:$0xff]  ;;  %v243_v45 = vld [vmem:[%s1916_s24 + $0x138] sm:$0xff] }
  0x95   : > { %1379 = vst [vmem:[%s1989_s16 + $0xe0] sm:$0xff] %v1284_v42  ;;  %v334_v53 = vmul.f32 %v1928_v6, %v238_v41  ;;  %v1285_v55 = vmax.f32 %v1190_v46, 0.0  ;;  %v1001_v56 = vmul.f32 %v1950_v24, %v905_v47  ;;  %v619_v57 = vmul.f32 %v1935_v11, %v523_v48 }
  0x96   : > { %v906_v58 = vmax.f32 %v811_v49, 0.0  ;;  %v1191_v59 = vadd.f32 %v1953_v28, %v1095_v50  ;;  %v524_v60 = vmax.f32 %v429_v51, 0.0  ;;  %v812_v61 = vadd.f32 %v1946_v20, %v716_v52 }
  0x97   : > { %v430_v62 = vadd.f32 %v1931_v8, %v334_v53  ;;  %1380 = vst [vmem:[%s1989_s16 + $0xe8] sm:$0xff] %v1285_v55  ;;  %v1096_v63 = vadd.f32 %v1001_v56, %v618_v44  ;;  %v717_v1 = vmul.f32 %v1941_v16, %v238_v41  ;;  %v335_v2 = vmul.f32 %v1928_v6, %v239_v54 }
  0x98   : > { %v1002_v0 = vmul.f32 %v1950_v24, %v906_v58  ;;  %v1286_v4 = vmax.f32 %v1191_v59, 0.0  ;;  %v620_v7 = vmul.f32 %v1935_v11, %v524_v60  ;;  %v907_v5 = vmax.f32 %v812_v61, 0.0  ;;  %v244_v58 = vld [vmem:[%s1916_s24 + $0x140] sm:$0xff] }
  0x99   : > { %v525_v9 = vmax.f32 %v430_v62, 0.0  ;;  %v1192_v10 = vadd.f32 %v1953_v28, %v1096_v63  ;;  %v813_v13 = vadd.f32 %v1946_v20, %v717_v1  ;;  %v431_v14 = vadd.f32 %v1931_v8, %v335_v2 }
  0x9a   : > { %v1097_v12 = vadd.f32 %v1002_v0, %v619_v57  ;;  %1381 = vst [vmem:[%s1989_s16 + $0xf0] sm:$0xff] %v1286_v4  ;;  %v1003_v15 = vmul.f32 %v1950_v24, %v907_v5  ;;  %v718_v18 = vmul.f32 %v1941_v16, %v239_v54  ;;  %v336_v19 = vmul.f32 %v1928_v6, %v240_v3 }
  0x9b   : > { %v621_v17 = vmul.f32 %v1935_v11, %v525_v9  ;;  %v1287_v22 = vmax.f32 %v1192_v10, 0.0  ;;  %v908_v25 = vmax.f32 %v813_v13, 0.0  ;;  %v526_v26 = vmax.f32 %v431_v14, 0.0  ;;  %v245_v9 = vld [vmem:[%s1916_s24 + $0x148] sm:$0xff] }
  0x9c   : > { %v1193_v23 = vadd.f32 %v1953_v28, %v1097_v12  ;;  %v1098_v27 = vadd.f32 %v1003_v15, %v620_v7  ;;  %v814_v29 = vadd.f32 %v1946_v20, %v718_v18  ;;  %v432_v30 = vadd.f32 %v1931_v8, %v336_v19 }
  0x9d   : > { %v719_v31 = vmul.f32 %v1941_v16, %v240_v3  ;;  %1382 = vst [vmem:[%s1989_s16 + $0xf8] sm:$0xff] %v1287_v22  ;;  %v1004_v34 = vmul.f32 %v1950_v24, %v908_v25  ;;  %v622_v35 = vmul.f32 %v1935_v11, %v526_v26  ;;  %v337_v36 = vmul.f32 %v1928_v6, %v241_v21 }
  0x9e   : > { %v1288_v33 = vmax.f32 %v1193_v23, 0.0  ;;  %v1194_v37 = vadd.f32 %v1953_v28, %v1098_v27  ;;  %v909_v38 = vmax.f32 %v814_v29, 0.0  ;;  %v527_v39 = vmax.f32 %v432_v30, 0.0 }
  0x9f   : > { %v815_v40 = vadd.f32 %v1946_v20, %v719_v31  ;;  %v1099_v41 = vadd.f32 %v1004_v34, %v621_v17  ;;  %v433_v42 = vadd.f32 %v1931_v8, %v337_v36  ;;  %v720_v43 = vmul.f32 %v1941_v16, %v241_v21  ;;  %v246_v21 = vld [vmem:[%s1916_s24 + $0x150] sm:$0xff]  ;;  %v247_v36 = vld [vmem:[%s1916_s24 + $0x158] sm:$0xff] }
  0xa0   : > { %1383 = vst [vmem:[%s1989_s16 + $0x100] sm:$0xff] %v1288_v33  ;;  %v338_v44 = vmul.f32 %v1928_v6, %v242_v32  ;;  %v1289_v46 = vmax.f32 %v1194_v37, 0.0  ;;  %v1005_v47 = vmul.f32 %v1950_v24, %v909_v38  ;;  %v623_v48 = vmul.f32 %v1935_v11, %v527_v39 }
  0xa1   : > { %v910_v49 = vmax.f32 %v815_v40, 0.0  ;;  %v1195_v50 = vadd.f32 %v1953_v28, %v1099_v41  ;;  %v528_v51 = vmax.f32 %v433_v42, 0.0  ;;  %v816_v52 = vadd.f32 %v1946_v20, %v720_v43 }
  0xa2   : > { %v434_v53 = vadd.f32 %v1931_v8, %v338_v44  ;;  %1384 = vst [vmem:[%s1989_s16 + $0x108] sm:$0xff] %v1289_v46  ;;  %v1100_v54 = vadd.f32 %v1005_v47, %v622_v35  ;;  %v721_v56 = vmul.f32 %v1941_v16, %v242_v32  ;;  %v339_v57 = vmul.f32 %v1928_v6, %v243_v45 }
  0xa3   : > { %v1006_v55 = vmul.f32 %v1950_v24, %v910_v49  ;;  %v1290_v59 = vmax.f32 %v1195_v50, 0.0  ;;  %v624_v60 = vmul.f32 %v1935_v11, %v528_v51  ;;  %v911_v61 = vmax.f32 %v816_v52, 0.0  ;;  %v248_v49 = vld [vmem:[%s1916_s24 + $0x160] sm:$0xff] }
  0xa4   : > { %v529_v62 = vmax.f32 %v434_v53, 0.0  ;;  %v1196_v63 = vadd.f32 %v1953_v28, %v1100_v54  ;;  %v817_v1 = vadd.f32 %v1946_v20, %v721_v56  ;;  %v435_v2 = vadd.f32 %v1931_v8, %v339_v57 }
  0xa5   : > { %v1101_v0 = vadd.f32 %v1006_v55, %v623_v48  ;;  %1385 = vst [vmem:[%s1989_s16 + $0x110] sm:$0xff] %v1290_v59  ;;  %v1007_v3 = vmul.f32 %v1950_v24, %v911_v61  ;;  %v722_v7 = vmul.f32 %v1941_v16, %v243_v45  ;;  %v340_v5 = vmul.f32 %v1928_v6, %v244_v58 }
  0xa6   : > { %v625_v4 = vmul.f32 %v1935_v11, %v529_v62  ;;  %v1291_v10 = vmax.f32 %v1196_v63, 0.0  ;;  %v912_v13 = vmax.f32 %v817_v1, 0.0  ;;  %v530_v14 = vmax.f32 %v435_v2, 0.0  ;;  %v249_v62 = vld [vmem:[%s1916_s24 + $0x168] sm:$0xff] }
  0xa7   : > { %v1197_v12 = vadd.f32 %v1953_v28, %v1101_v0  ;;  %v1102_v15 = vadd.f32 %v1007_v3, %v624_v60  ;;  %v818_v17 = vadd.f32 %v1946_v20, %v722_v7  ;;  %v436_v18 = vadd.f32 %v1931_v8, %v340_v5 }
  0xa8   : > { %v723_v19 = vmul.f32 %v1941_v16, %v244_v58  ;;  %1386 = vst [vmem:[%s1989_s16 + $0x118] sm:$0xff] %v1291_v10  ;;  %v1008_v23 = vmul.f32 %v1950_v24, %v912_v13  ;;  %v626_v25 = vmul.f32 %v1935_v11, %v530_v14  ;;  %v341_v26 = vmul.f32 %v1928_v6, %v245_v9 }
  0xa9   : > { %v1292_v22 = vmax.f32 %v1197_v12, 0.0  ;;  %v1198_v27 = vadd.f32 %v1953_v28, %v1102_v15  ;;  %v913_v29 = vmax.f32 %v818_v17, 0.0  ;;  %v531_v30 = vmax.f32 %v436_v18, 0.0 }
  0xaa   : > { %v819_v31 = vadd.f32 %v1946_v20, %v723_v19  ;;  %v1103_v32 = vadd.f32 %v1008_v23, %v625_v4  ;;  %v437_v33 = vadd.f32 %v1931_v8, %v341_v26  ;;  %v724_v34 = vmul.f32 %v1941_v16, %v245_v9  ;;  %v250_v9 = vld [vmem:[%s1916_s24 + $0x170] sm:$0xff]  ;;  %v251_v26 = vld [vmem:[%s1916_s24 + $0x178] sm:$0xff] }
  0xab   : > { %1387 = vst [vmem:[%s1989_s16 + $0x120] sm:$0xff] %v1292_v22  ;;  %v342_v35 = vmul.f32 %v1928_v6, %v246_v21  ;;  %v1293_v37 = vmax.f32 %v1198_v27, 0.0  ;;  %v1009_v38 = vmul.f32 %v1950_v24, %v913_v29  ;;  %v627_v39 = vmul.f32 %v1935_v11, %v531_v30 }
  0xac   : > { %v914_v40 = vmax.f32 %v819_v31, 0.0  ;;  %v1199_v41 = vadd.f32 %v1953_v28, %v1103_v32  ;;  %v532_v42 = vmax.f32 %v437_v33, 0.0  ;;  %v820_v43 = vadd.f32 %v1946_v20, %v724_v34 }
  0xad   : > { %v438_v44 = vadd.f32 %v1931_v8, %v342_v35  ;;  %1388 = vst [vmem:[%s1989_s16 + $0x128] sm:$0xff] %v1293_v37  ;;  %v1104_v45 = vadd.f32 %v1009_v38, %v626_v25  ;;  %v725_v47 = vmul.f32 %v1941_v16, %v246_v21  ;;  %v343_v48 = vmul.f32 %v1928_v6, %v247_v36 }
  0xae   : > { %v1010_v46 = vmul.f32 %v1950_v24, %v914_v40  ;;  %v1294_v50 = vmax.f32 %v1199_v41, 0.0  ;;  %v628_v51 = vmul.f32 %v1935_v11, %v532_v42  ;;  %v915_v52 = vmax.f32 %v820_v43, 0.0  ;;  %v252_v40 = vld [vmem:[%s1916_s24 + $0x180] sm:$0xff] }
  0xaf   : > { %v533_v53 = vmax.f32 %v438_v44, 0.0  ;;  %v1200_v54 = vadd.f32 %v1953_v28, %v1104_v45  ;;  %v821_v56 = vadd.f32 %v1946_v20, %v725_v47  ;;  %v439_v57 = vadd.f32 %v1931_v8, %v343_v48 }
  0xb0   : > { %v1105_v55 = vadd.f32 %v1010_v46, %v627_v39  ;;  %1389 = vst [vmem:[%s1989_s16 + $0x130] sm:$0xff] %v1294_v50  ;;  %v1011_v58 = vmul.f32 %v1950_v24, %v915_v52  ;;  %v726_v60 = vmul.f32 %v1941_v16, %v247_v36  ;;  %v344_v61 = vmul.f32 %v1928_v6, %v248_v49 }
  0xb1   : > { %v629_v59 = vmul.f32 %v1935_v11, %v533_v53  ;;  %v1295_v63 = vmax.f32 %v1200_v54, 0.0  ;;  %v916_v1 = vmax.f32 %v821_v56, 0.0  ;;  %v534_v2 = vmax.f32 %v439_v57, 0.0  ;;  %v253_v53 = vld [vmem:[%s1916_s24 + $0x188] sm:$0xff] }
  0xb2   : > { %v1201_v0 = vadd.f32 %v1953_v28, %v1105_v55  ;;  %v1106_v3 = vadd.f32 %v1011_v58, %v628_v51  ;;  %v822_v4 = vadd.f32 %v1946_v20, %v726_v60  ;;  %v440_v7 = vadd.f32 %v1931_v8, %v344_v61 }
  0xb3   : > { %v727_v5 = vmul.f32 %v1941_v16, %v248_v49  ;;  %1390 = vst [vmem:[%s1989_s16 + $0x138] sm:$0xff] %v1295_v63  ;;  %v1012_v12 = vmul.f32 %v1950_v24, %v916_v1  ;;  %v630_v13 = vmul.f32 %v1935_v11, %v534_v2  ;;  %v345_v14 = vmul.f32 %v1928_v6, %v249_v62 }
  0xb4   : > { %v1296_v10 = vmax.f32 %v1201_v0, 0.0  ;;  %v1202_v15 = vadd.f32 %v1953_v28, %v1106_v3  ;;  %v917_v17 = vmax.f32 %v822_v4, 0.0  ;;  %v535_v18 = vmax.f32 %v440_v7, 0.0 }
  0xb5   : > { %v823_v19 = vadd.f32 %v1946_v20, %v727_v5  ;;  %v1107_v21 = vadd.f32 %v1012_v12, %v629_v59  ;;  %v441_v22 = vadd.f32 %v1931_v8, %v345_v14  ;;  %v728_v23 = vmul.f32 %v1941_v16, %v249_v62  ;;  %v254_v62 = vld [vmem:[%s1916_s24 + $0x190] sm:$0xff]  ;;  %v255_v14 = vld [vmem:[%s1916_s24 + $0x198] sm:$0xff] }
  0xb6   : > { %1391 = vst [vmem:[%s1989_s16 + $0x140] sm:$0xff] %v1296_v10  ;;  %v346_v25 = vmul.f32 %v1928_v6, %v250_v9  ;;  %v1297_v27 = vmax.f32 %v1202_v15, 0.0  ;;  %v1013_v29 = vmul.f32 %v1950_v24, %v917_v17  ;;  %v631_v30 = vmul.f32 %v1935_v11, %v535_v18 }
  0xb7   : > { %v918_v31 = vmax.f32 %v823_v19, 0.0  ;;  %v1203_v32 = vadd.f32 %v1953_v28, %v1107_v21  ;;  %v536_v33 = vmax.f32 %v441_v22, 0.0  ;;  %v824_v34 = vadd.f32 %v1946_v20, %v728_v23 }
  0xb8   : > { %v442_v35 = vadd.f32 %v1931_v8, %v346_v25  ;;  %1392 = vst [vmem:[%s1989_s16 + $0x148] sm:$0xff] %v1297_v27  ;;  %v1108_v36 = vadd.f32 %v1013_v29, %v630_v13  ;;  %v729_v38 = vmul.f32 %v1941_v16, %v250_v9  ;;  %v347_v39 = vmul.f32 %v1928_v6, %v251_v26 }
  0xb9   : > { %v1014_v37 = vmul.f32 %v1950_v24, %v918_v31  ;;  %v1298_v41 = vmax.f32 %v1203_v32, 0.0  ;;  %v632_v42 = vmul.f32 %v1935_v11, %v536_v33  ;;  %v919_v43 = vmax.f32 %v824_v34, 0.0  ;;  %v256_v31 = vld [vmem:[%s1916_s24 + $0x1a0] sm:$0xff] }
  0xba   : > { %v537_v44 = vmax.f32 %v442_v35, 0.0  ;;  %v1204_v45 = vadd.f32 %v1953_v28, %v1108_v36  ;;  %v825_v47 = vadd.f32 %v1946_v20, %v729_v38  ;;  %v443_v48 = vadd.f32 %v1931_v8, %v347_v39 }
  0xbb   : > { %v1109_v46 = vadd.f32 %v1014_v37, %v631_v30  ;;  %1393 = vst [vmem:[%s1989_s16 + $0x150] sm:$0xff] %v1298_v41  ;;  %v1015_v49 = vmul.f32 %v1950_v24, %v919_v43  ;;  %v730_v51 = vmul.f32 %v1941_v16, %v251_v26  ;;  %v348_v52 = vmul.f32 %v1928_v6, %v252_v40 }
  0xbc   : > { %v633_v50 = vmul.f32 %v1935_v11, %v537_v44  ;;  %v1299_v54 = vmax.f32 %v1204_v45, 0.0  ;;  %v920_v56 = vmax.f32 %v825_v47, 0.0  ;;  %v538_v57 = vmax.f32 %v443_v48, 0.0  ;;  %v257_v44 = vld [vmem:[%s1916_s24 + $0x1a8] sm:$0xff] }
  0xbd   : > { %v1205_v55 = vadd.f32 %v1953_v28, %v1109_v46  ;;  %v1110_v58 = vadd.f32 %v1015_v49, %v632_v42  ;;  %v826_v59 = vadd.f32 %v1946_v20, %v730_v51  ;;  %v444_v60 = vadd.f32 %v1931_v8, %v348_v52 }
  0xbe   : > { %v731_v61 = vmul.f32 %v1941_v16, %v252_v40  ;;  %1394 = vst [vmem:[%s1989_s16 + $0x158] sm:$0xff] %v1299_v54  ;;  %v1016_v0 = vmul.f32 %v1950_v24, %v920_v56  ;;  %v634_v1 = vmul.f32 %v1935_v11, %v538_v57  ;;  %v349_v2 = vmul.f32 %v1928_v6, %v253_v53 }
  0xbf   : > { %v1300_v63 = vmax.f32 %v1205_v55, 0.0  ;;  %v1206_v3 = vadd.f32 %v1953_v28, %v1110_v58  ;;  %v921_v4 = vmax.f32 %v826_v59, 0.0  ;;  %v539_v7 = vmax.f32 %v444_v60, 0.0 }
  0xc0   : > { %v827_v5 = vadd.f32 %v1946_v20, %v731_v61  ;;  %v1111_v9 = vadd.f32 %v1016_v0, %v633_v50  ;;  %v445_v10 = vadd.f32 %v1931_v8, %v349_v2  ;;  %v732_v12 = vmul.f32 %v1941_v16, %v253_v53  ;;  %v258_v53 = vld [vmem:[%s1916_s24 + $0x1b0] sm:$0xff]  ;;  %v259_v2 = vld [vmem:[%s1916_s24 + $0x1b8] sm:$0xff] }
  0xc1   : > { %1395 = vst [vmem:[%s1989_s16 + $0x160] sm:$0xff] %v1300_v63  ;;  %v350_v13 = vmul.f32 %v1928_v6, %v254_v62  ;;  %v1301_v15 = vmax.f32 %v1206_v3, 0.0  ;;  %v1017_v17 = vmul.f32 %v1950_v24, %v921_v4  ;;  %v635_v18 = vmul.f32 %v1935_v11, %v539_v7 }
  0xc2   : > { %v922_v19 = vmax.f32 %v827_v5, 0.0  ;;  %v1207_v21 = vadd.f32 %v1953_v28, %v1111_v9  ;;  %v540_v22 = vmax.f32 %v445_v10, 0.0  ;;  %v828_v23 = vadd.f32 %v1946_v20, %v732_v12 }
  0xc3   : > { %v446_v25 = vadd.f32 %v1931_v8, %v350_v13  ;;  %1396 = vst [vmem:[%s1989_s16 + $0x168] sm:$0xff] %v1301_v15  ;;  %v1112_v26 = vadd.f32 %v1017_v17, %v634_v1  ;;  %v733_v29 = vmul.f32 %v1941_v16, %v254_v62  ;;  %v351_v30 = vmul.f32 %v1928_v6, %v255_v14 }
  0xc4   : > { %v1018_v27 = vmul.f32 %v1950_v24, %v922_v19  ;;  %v1302_v32 = vmax.f32 %v1207_v21, 0.0  ;;  %v636_v33 = vmul.f32 %v1935_v11, %v540_v22  ;;  %v923_v34 = vmax.f32 %v828_v23, 0.0  ;;  %v260_v19 = vld [vmem:[%s1916_s24 + $0x1c0] sm:$0xff] }
  0xc5   : > { %v541_v35 = vmax.f32 %v446_v25, 0.0  ;;  %v1208_v36 = vadd.f32 %v1953_v28, %v1112_v26  ;;  %v829_v38 = vadd.f32 %v1946_v20, %v733_v29  ;;  %v447_v39 = vadd.f32 %v1931_v8, %v351_v30 }
  0xc6   : > { %v1113_v37 = vadd.f32 %v1018_v27, %v635_v18  ;;  %1397 = vst [vmem:[%s1989_s16 + $0x170] sm:$0xff] %v1302_v32  ;;  %v1019_v40 = vmul.f32 %v1950_v24, %v923_v34  ;;  %v734_v42 = vmul.f32 %v1941_v16, %v255_v14  ;;  %v352_v43 = vmul.f32 %v1928_v6, %v256_v31 }
  0xc7   : > { %v637_v41 = vmul.f32 %v1935_v11, %v541_v35  ;;  %v1303_v45 = vmax.f32 %v1208_v36, 0.0  ;;  %v924_v47 = vmax.f32 %v829_v38, 0.0  ;;  %v542_v48 = vmax.f32 %v447_v39, 0.0  ;;  %v261_v35 = vld [vmem:[%s1916_s24 + $0x1c8] sm:$0xff] }
  0xc8   : > { %v1209_v46 = vadd.f32 %v1953_v28, %v1113_v37  ;;  %v1114_v49 = vadd.f32 %v1019_v40, %v636_v33  ;;  %v830_v50 = vadd.f32 %v1946_v20, %v734_v42  ;;  %v448_v51 = vadd.f32 %v1931_v8, %v352_v43 }
  0xc9   : > { %v735_v52 = vmul.f32 %v1941_v16, %v256_v31  ;;  %1398 = vst [vmem:[%s1989_s16 + $0x178] sm:$0xff] %v1303_v45  ;;  %v1020_v55 = vmul.f32 %v1950_v24, %v924_v47  ;;  %v638_v56 = vmul.f32 %v1935_v11, %v542_v48  ;;  %v353_v57 = vmul.f32 %v1928_v6, %v257_v44 }
  0xca   : > { %v1304_v54 = vmax.f32 %v1209_v46, 0.0  ;;  %v1210_v58 = vadd.f32 %v1953_v28, %v1114_v49  ;;  %v925_v59 = vmax.f32 %v830_v50, 0.0  ;;  %v543_v60 = vmax.f32 %v448_v51, 0.0 }
  0xcb   : > { %v831_v61 = vadd.f32 %v1946_v20, %v735_v52  ;;  %v1115_v62 = vadd.f32 %v1020_v55, %v637_v41  ;;  %v449_v63 = vadd.f32 %v1931_v8, %v353_v57  ;;  %v736_v0 = vmul.f32 %v1941_v16, %v257_v44  ;;  %v262_v44 = vld [vmem:[%s1916_s24 + $0x1d0] sm:$0xff]  ;;  %v263_v57 = vld [vmem:[%s1916_s24 + $0x1d8] sm:$0xff] }
  0xcc   : > { %1399 = vst [vmem:[%s1989_s16 + $0x180] sm:$0xff] %v1304_v54  ;;  %v354_v1 = vmul.f32 %v1928_v6, %v258_v53  ;;  %v1305_v3 = vmax.f32 %v1210_v58, 0.0  ;;  %v1021_v4 = vmul.f32 %v1950_v24, %v925_v59  ;;  %v639_v7 = vmul.f32 %v1935_v11, %v543_v60 }
  0xcd   : > { %v926_v5 = vmax.f32 %v831_v61, 0.0  ;;  %v1211_v9 = vadd.f32 %v1953_v28, %v1115_v62  ;;  %v544_v10 = vmax.f32 %v449_v63, 0.0  ;;  %v832_v12 = vadd.f32 %v1946_v20, %v736_v0 }
  0xce   : > { %v450_v13 = vadd.f32 %v1931_v8, %v354_v1  ;;  %1400 = vst [vmem:[%s1989_s16 + $0x188] sm:$0xff] %v1305_v3  ;;  %v1116_v14 = vadd.f32 %v1021_v4, %v638_v56  ;;  %v737_v17 = vmul.f32 %v1941_v16, %v258_v53  ;;  %v355_v18 = vmul.f32 %v1928_v6, %v259_v2 }
  0xcf   : > { %v1022_v15 = vmul.f32 %v1950_v24, %v926_v5  ;;  %v1306_v21 = vmax.f32 %v1211_v9, 0.0  ;;  %v640_v22 = vmul.f32 %v1935_v11, %v544_v10  ;;  %v927_v23 = vmax.f32 %v832_v12, 0.0  ;;  %v264_v5 = vld [vmem:[%s1916_s24 + $0x1e0] sm:$0xff] }
  0xd0   : > { %v545_v25 = vmax.f32 %v450_v13, 0.0  ;;  %v1212_v26 = vadd.f32 %v1953_v28, %v1116_v14  ;;  %v833_v29 = vadd.f32 %v1946_v20, %v737_v17  ;;  %v451_v30 = vadd.f32 %v1931_v8, %v355_v18 }
  0xd1   : > { %v1117_v27 = vadd.f32 %v1022_v15, %v639_v7  ;;  %1401 = vst [vmem:[%s1989_s16 + $0x190] sm:$0xff] %v1306_v21  ;;  %v1023_v31 = vmul.f32 %v1950_v24, %v927_v23  ;;  %v738_v33 = vmul.f32 %v1941_v16, %v259_v2  ;;  %v356_v34 = vmul.f32 %v1928_v6, %v260_v19 }
  0xd2   : > { %v641_v32 = vmul.f32 %v1935_v11, %v545_v25  ;;  %v1307_v36 = vmax.f32 %v1212_v26, 0.0  ;;  %v928_v38 = vmax.f32 %v833_v29, 0.0  ;;  %v546_v39 = vmax.f32 %v451_v30, 0.0  ;;  %v265_v25 = vld [vmem:[%s1916_s24 + $0x1e8] sm:$0xff] }
  0xd3   : > { %v1213_v37 = vadd.f32 %v1953_v28, %v1117_v27  ;;  %v1118_v40 = vadd.f32 %v1023_v31, %v640_v22  ;;  %v834_v41 = vadd.f32 %v1946_v20, %v738_v33  ;;  %v452_v42 = vadd.f32 %v1931_v8, %v356_v34 }
  0xd4   : > { %v739_v43 = vmul.f32 %v1941_v16, %v260_v19  ;;  %1402 = vst [vmem:[%s1989_s16 + $0x198] sm:$0xff] %v1307_v36  ;;  %v1024_v46 = vmul.f32 %v1950_v24, %v928_v38  ;;  %v642_v47 = vmul.f32 %v1935_v11, %v546_v39  ;;  %v357_v48 = vmul.f32 %v1928_v6, %v261_v35 }
  0xd5   : > { %v1308_v45 = vmax.f32 %v1213_v37, 0.0  ;;  %v1214_v49 = vadd.f32 %v1953_v28, %v1118_v40  ;;  %v929_v50 = vmax.f32 %v834_v41, 0.0  ;;  %v547_v51 = vmax.f32 %v452_v42, 0.0 }
  0xd6   : > { %v835_v52 = vadd.f32 %v1946_v20, %v739_v43  ;;  %v1119_v53 = vadd.f32 %v1024_v46, %v641_v32  ;;  %v453_v54 = vadd.f32 %v1931_v8, %v357_v48  ;;  %v740_v55 = vmul.f32 %v1941_v16, %v261_v35  ;;  %v266_v35 = vld [vmem:[%s1916_s24 + $0x1f0] sm:$0xff]  ;;  %v267_v48 = vld [vmem:[%s1916_s24 + $0x1f8] sm:$0xff] }
  0xd7   : > { %1403 = vst [vmem:[%s1989_s16 + $0x1a0] sm:$0xff] %v1308_v45  ;;  %v358_v56 = vmul.f32 %v1928_v6, %v262_v44  ;;  %v1309_v58 = vmax.f32 %v1214_v49, 0.0  ;;  %v1025_v59 = vmul.f32 %v1950_v24, %v929_v50  ;;  %v643_v60 = vmul.f32 %v1935_v11, %v547_v51 }
  0xd8   : > { %v930_v61 = vmax.f32 %v835_v52, 0.0  ;;  %v1215_v62 = vadd.f32 %v1953_v28, %v1119_v53  ;;  %v548_v63 = vmax.f32 %v453_v54, 0.0  ;;  %v836_v0 = vadd.f32 %v1946_v20, %v740_v55 }
  0xd9   : > { %v454_v1 = vadd.f32 %v1931_v8, %v358_v56  ;;  %1404 = vst [vmem:[%s1989_s16 + $0x1a8] sm:$0xff] %v1309_v58  ;;  %v1120_v2 = vadd.f32 %v1025_v59, %v642_v47  ;;  %v741_v4 = vmul.f32 %v1941_v16, %v262_v44  ;;  %v359_v7 = vmul.f32 %v1928_v6, %v263_v57 }
  0xda   : > { %v1026_v3 = vmul.f32 %v1950_v24, %v930_v61  ;;  %v1310_v9 = vmax.f32 %v1215_v62, 0.0  ;;  %v644_v10 = vmul.f32 %v1935_v11, %v548_v63  ;;  %v931_v12 = vmax.f32 %v836_v0, 0.0  ;;  %v268_v61 = vld [vmem:[%s1916_s24 + $0x200] sm:$0xff] }
  0xdb   : > { %v549_v13 = vmax.f32 %v454_v1, 0.0  ;;  %v1216_v14 = vadd.f32 %v1953_v28, %v1120_v2  ;;  %v837_v17 = vadd.f32 %v1946_v20, %v741_v4  ;;  %v455_v18 = vadd.f32 %v1931_v8, %v359_v7 }
  0xdc   : > { %v1121_v15 = vadd.f32 %v1026_v3, %v643_v60  ;;  %1405 = vst [vmem:[%s1989_s16 + $0x1b0] sm:$0xff] %v1310_v9  ;;  %v1027_v19 = vmul.f32 %v1950_v24, %v931_v12  ;;  %v742_v22 = vmul.f32 %v1941_v16, %v263_v57  ;;  %v360_v23 = vmul.f32 %v1928_v6, %v264_v5 }
  0xdd   : > { %v645_v21 = vmul.f32 %v1935_v11, %v549_v13  ;;  %v1311_v26 = vmax.f32 %v1216_v14, 0.0  ;;  %v932_v29 = vmax.f32 %v837_v17, 0.0  ;;  %v550_v30 = vmax.f32 %v455_v18, 0.0  ;;  %v269_v13 = vld [vmem:[%s1916_s24 + $0x208] sm:$0xff] }
  0xde   : > { %v1217_v27 = vadd.f32 %v1953_v28, %v1121_v15  ;;  %v1122_v31 = vadd.f32 %v1027_v19, %v644_v10  ;;  %v838_v32 = vadd.f32 %v1946_v20, %v742_v22  ;;  %v456_v33 = vadd.f32 %v1931_v8, %v360_v23 }
  0xdf   : > { %v743_v34 = vmul.f32 %v1941_v16, %v264_v5  ;;  %1406 = vst [vmem:[%s1989_s16 + $0x1b8] sm:$0xff] %v1311_v26  ;;  %v1028_v37 = vmul.f32 %v1950_v24, %v932_v29  ;;  %v646_v38 = vmul.f32 %v1935_v11, %v550_v30  ;;  %v361_v39 = vmul.f32 %v1928_v6, %v265_v25 }
  0xe0   : > { %v1312_v36 = vmax.f32 %v1217_v27, 0.0  ;;  %v1218_v40 = vadd.f32 %v1953_v28, %v1122_v31  ;;  %v933_v41 = vmax.f32 %v838_v32, 0.0  ;;  %v551_v42 = vmax.f32 %v456_v33, 0.0 }
  0xe1   : > { %v839_v43 = vadd.f32 %v1946_v20, %v743_v34  ;;  %v1123_v44 = vadd.f32 %v1028_v37, %v645_v21  ;;  %v457_v45 = vadd.f32 %v1931_v8, %v361_v39  ;;  %v744_v46 = vmul.f32 %v1941_v16, %v265_v25  ;;  %v270_v25 = vld [vmem:[%s1916_s24 + $0x210] sm:$0xff]  ;;  %v271_v39 = vld [vmem:[%s1916_s24 + $0x218] sm:$0xff] }
  0xe2   : > { %1407 = vst [vmem:[%s1989_s16 + $0x1c0] sm:$0xff] %v1312_v36  ;;  %v362_v47 = vmul.f32 %v1928_v6, %v266_v35  ;;  %v1313_v49 = vmax.f32 %v1218_v40, 0.0  ;;  %v1029_v50 = vmul.f32 %v1950_v24, %v933_v41  ;;  %v647_v51 = vmul.f32 %v1935_v11, %v551_v42 }
  0xe3   : > { %v934_v52 = vmax.f32 %v839_v43, 0.0  ;;  %v1219_v53 = vadd.f32 %v1953_v28, %v1123_v44  ;;  %v552_v54 = vmax.f32 %v457_v45, 0.0  ;;  %v840_v55 = vadd.f32 %v1946_v20, %v744_v46 }
  0xe4   : > { %v458_v56 = vadd.f32 %v1931_v8, %v362_v47  ;;  %1408 = vst [vmem:[%s1989_s16 + $0x1c8] sm:$0xff] %v1313_v49  ;;  %v1124_v57 = vadd.f32 %v1029_v50, %v646_v38  ;;  %v745_v59 = vmul.f32 %v1941_v16, %v266_v35  ;;  %v363_v60 = vmul.f32 %v1928_v6, %v267_v48 }
  0xe5   : > { %v1030_v58 = vmul.f32 %v1950_v24, %v934_v52  ;;  %v1314_v62 = vmax.f32 %v1219_v53, 0.0  ;;  %v648_v63 = vmul.f32 %v1935_v11, %v552_v54  ;;  %v935_v0 = vmax.f32 %v840_v55, 0.0  ;;  %v272_v52 = vld [vmem:[%s1916_s24 + $0x220] sm:$0xff] }
  0xe6   : > { %v553_v1 = vmax.f32 %v458_v56, 0.0  ;;  %v1220_v2 = vadd.f32 %v1953_v28, %v1124_v57  ;;  %v841_v4 = vadd.f32 %v1946_v20, %v745_v59  ;;  %v459_v7 = vadd.f32 %v1931_v8, %v363_v60 }
  0xe7   : > { %v1125_v3 = vadd.f32 %v1030_v58, %v647_v51  ;;  %1409 = vst [vmem:[%s1989_s16 + $0x1d0] sm:$0xff] %v1314_v62  ;;  %v1031_v5 = vmul.f32 %v1950_v24, %v935_v0  ;;  %v746_v10 = vmul.f32 %v1941_v16, %v267_v48  ;;  %v364_v12 = vmul.f32 %v1928_v6, %v268_v61 }
  0xe8   : > { %v649_v9 = vmul.f32 %v1935_v11, %v553_v1  ;;  %v1315_v14 = vmax.f32 %v1220_v2, 0.0  ;;  %v936_v17 = vmax.f32 %v841_v4, 0.0  ;;  %v554_v18 = vmax.f32 %v459_v7, 0.0  ;;  %v273_v1 = vld [vmem:[%s1916_s24 + $0x228] sm:$0xff] }
  0xe9   : > { %v1221_v15 = vadd.f32 %v1953_v28, %v1125_v3  ;;  %v1126_v19 = vadd.f32 %v1031_v5, %v648_v63  ;;  %v842_v21 = vadd.f32 %v1946_v20, %v746_v10  ;;  %v460_v22 = vadd.f32 %v1931_v8, %v364_v12 }
  0xea   : > { %v747_v23 = vmul.f32 %v1941_v16, %v268_v61  ;;  %1410 = vst [vmem:[%s1989_s16 + $0x1d8] sm:$0xff] %v1315_v14  ;;  %v1032_v27 = vmul.f32 %v1950_v24, %v936_v17  ;;  %v650_v29 = vmul.f32 %v1935_v11, %v554_v18  ;;  %v365_v30 = vmul.f32 %v1928_v6, %v269_v13 }
  0xeb   : > { %v1316_v26 = vmax.f32 %v1221_v15, 0.0  ;;  %v1222_v31 = vadd.f32 %v1953_v28, %v1126_v19  ;;  %v937_v32 = vmax.f32 %v842_v21, 0.0  ;;  %v555_v33 = vmax.f32 %v460_v22, 0.0 }
  0xec   : > { %v843_v34 = vadd.f32 %v1946_v20, %v747_v23  ;;  %v1127_v35 = vadd.f32 %v1032_v27, %v649_v9  ;;  %v461_v36 = vadd.f32 %v1931_v8, %v365_v30  ;;  %v748_v37 = vmul.f32 %v1941_v16, %v269_v13  ;;  %v274_v13 = vld [vmem:[%s1916_s24 + $0x230] sm:$0xff]  ;;  %v275_v30 = vld [vmem:[%s1916_s24 + $0x238] sm:$0xff] }
  0xed   : > { %1411 = vst [vmem:[%s1989_s16 + $0x1e0] sm:$0xff] %v1316_v26  ;;  %v366_v38 = vmul.f32 %v1928_v6, %v270_v25  ;;  %v1317_v40 = vmax.f32 %v1222_v31, 0.0  ;;  %v1033_v41 = vmul.f32 %v1950_v24, %v937_v32  ;;  %v651_v42 = vmul.f32 %v1935_v11, %v555_v33 }
  0xee   : > { %v938_v43 = vmax.f32 %v843_v34, 0.0  ;;  %v1223_v44 = vadd.f32 %v1953_v28, %v1127_v35  ;;  %v556_v45 = vmax.f32 %v461_v36, 0.0  ;;  %v844_v46 = vadd.f32 %v1946_v20, %v748_v37 }
  0xef   : > { %v462_v47 = vadd.f32 %v1931_v8, %v366_v38  ;;  %1412 = vst [vmem:[%s1989_s16 + $0x1e8] sm:$0xff] %v1317_v40  ;;  %v1128_v48 = vadd.f32 %v1033_v41, %v650_v29  ;;  %v749_v50 = vmul.f32 %v1941_v16, %v270_v25  ;;  %v367_v51 = vmul.f32 %v1928_v6, %v271_v39 }
  0xf0   : > { %v1034_v49 = vmul.f32 %v1950_v24, %v938_v43  ;;  %v1318_v53 = vmax.f32 %v1223_v44, 0.0  ;;  %v652_v54 = vmul.f32 %v1935_v11, %v556_v45  ;;  %v939_v55 = vmax.f32 %v844_v46, 0.0  ;;  %v276_v43 = vld [vmem:[%s1916_s24 + $0x240] sm:$0xff] }
  0xf1   : > { %v557_v56 = vmax.f32 %v462_v47, 0.0  ;;  %v1224_v57 = vadd.f32 %v1953_v28, %v1128_v48  ;;  %v845_v59 = vadd.f32 %v1946_v20, %v749_v50  ;;  %v463_v60 = vadd.f32 %v1931_v8, %v367_v51 }
  0xf2   : > { %v1129_v58 = vadd.f32 %v1034_v49, %v651_v42  ;;  %1413 = vst [vmem:[%s1989_s16 + $0x1f0] sm:$0xff] %v1318_v53  ;;  %v1035_v61 = vmul.f32 %v1950_v24, %v939_v55  ;;  %v750_v63 = vmul.f32 %v1941_v16, %v271_v39  ;;  %v368_v0 = vmul.f32 %v1928_v6, %v272_v52 }
  0xf3   : > { %v653_v62 = vmul.f32 %v1935_v11, %v557_v56  ;;  %v1319_v2 = vmax.f32 %v1224_v57, 0.0  ;;  %v940_v4 = vmax.f32 %v845_v59, 0.0  ;;  %v558_v7 = vmax.f32 %v463_v60, 0.0  ;;  %v277_v56 = vld [vmem:[%s1916_s24 + $0x248] sm:$0xff] }
  0xf4   : > { %v1225_v3 = vadd.f32 %v1953_v28, %v1129_v58  ;;  %v1130_v5 = vadd.f32 %v1035_v61, %v652_v54  ;;  %v846_v9 = vadd.f32 %v1946_v20, %v750_v63  ;;  %v464_v10 = vadd.f32 %v1931_v8, %v368_v0 }
  0xf5   : > { %v751_v12 = vmul.f32 %v1941_v16, %v272_v52  ;;  %1414 = vst [vmem:[%s1989_s16 + $0x1f8] sm:$0xff] %v1319_v2  ;;  %v1036_v15 = vmul.f32 %v1950_v24, %v940_v4  ;;  %v654_v17 = vmul.f32 %v1935_v11, %v558_v7  ;;  %v369_v18 = vmul.f32 %v1928_v6, %v273_v1 }
  0xf6   : > { %v1320_v14 = vmax.f32 %v1225_v3, 0.0  ;;  %v1226_v19 = vadd.f32 %v1953_v28, %v1130_v5  ;;  %v941_v21 = vmax.f32 %v846_v9, 0.0  ;;  %v559_v22 = vmax.f32 %v464_v10, 0.0 }
  0xf7   : > { %v847_v23 = vadd.f32 %v1946_v20, %v751_v12  ;;  %v1131_v25 = vadd.f32 %v1036_v15, %v653_v62  ;;  %v465_v26 = vadd.f32 %v1931_v8, %v369_v18  ;;  %v752_v27 = vmul.f32 %v1941_v16, %v273_v1  ;;  %v278_v1 = vld [vmem:[%s1916_s24 + $0x250] sm:$0xff]  ;;  %v279_v18 = vld [vmem:[%s1916_s24 + $0x258] sm:$0xff] }
  0xf8   : > { %1415 = vst [vmem:[%s1989_s16 + $0x200] sm:$0xff] %v1320_v14  ;;  %v370_v29 = vmul.f32 %v1928_v6, %v274_v13  ;;  %v1321_v31 = vmax.f32 %v1226_v19, 0.0  ;;  %v1037_v32 = vmul.f32 %v1950_v24, %v941_v21  ;;  %v655_v33 = vmul.f32 %v1935_v11, %v559_v22 }
  0xf9   : > { %v942_v34 = vmax.f32 %v847_v23, 0.0  ;;  %v1227_v35 = vadd.f32 %v1953_v28, %v1131_v25  ;;  %v560_v36 = vmax.f32 %v465_v26, 0.0  ;;  %v848_v37 = vadd.f32 %v1946_v20, %v752_v27 }
  0xfa   : > { %v466_v38 = vadd.f32 %v1931_v8, %v370_v29  ;;  %1416 = vst [vmem:[%s1989_s16 + $0x208] sm:$0xff] %v1321_v31  ;;  %v1132_v39 = vadd.f32 %v1037_v32, %v654_v17  ;;  %v753_v41 = vmul.f32 %v1941_v16, %v274_v13  ;;  %v371_v42 = vmul.f32 %v1928_v6, %v275_v30 }
  0xfb   : > { %v1038_v40 = vmul.f32 %v1950_v24, %v942_v34  ;;  %v1322_v44 = vmax.f32 %v1227_v35, 0.0  ;;  %v656_v45 = vmul.f32 %v1935_v11, %v560_v36  ;;  %v943_v46 = vmax.f32 %v848_v37, 0.0  ;;  %v280_v34 = vld [vmem:[%s1916_s24 + $0x260] sm:$0xff] }
  0xfc   : > { %v561_v47 = vmax.f32 %v466_v38, 0.0  ;;  %v1228_v48 = vadd.f32 %v1953_v28, %v1132_v39  ;;  %v849_v50 = vadd.f32 %v1946_v20, %v753_v41  ;;  %v467_v51 = vadd.f32 %v1931_v8, %v371_v42 }
  0xfd   : > { %v1133_v49 = vadd.f32 %v1038_v40, %v655_v33  ;;  %1417 = vst [vmem:[%s1989_s16 + $0x210] sm:$0xff] %v1322_v44  ;;  %v1039_v52 = vmul.f32 %v1950_v24, %v943_v46  ;;  %v754_v54 = vmul.f32 %v1941_v16, %v275_v30  ;;  %v372_v55 = vmul.f32 %v1928_v6, %v276_v43 }
  0xfe   : > { %v657_v53 = vmul.f32 %v1935_v11, %v561_v47  ;;  %v1323_v57 = vmax.f32 %v1228_v48, 0.0  ;;  %v944_v59 = vmax.f32 %v849_v50, 0.0  ;;  %v562_v60 = vmax.f32 %v467_v51, 0.0  ;;  %v281_v47 = vld [vmem:[%s1916_s24 + $0x268] sm:$0xff] }
  0xff   : > { %v1229_v58 = vadd.f32 %v1953_v28, %v1133_v49  ;;  %v1134_v61 = vadd.f32 %v1039_v52, %v656_v45  ;;  %v850_v62 = vadd.f32 %v1946_v20, %v754_v54  ;;  %v468_v63 = vadd.f32 %v1931_v8, %v372_v55 }
 0x100   : > { %v755_v0 = vmul.f32 %v1941_v16, %v276_v43  ;;  %1418 = vst [vmem:[%s1989_s16 + $0x218] sm:$0xff] %v1323_v57  ;;  %v1040_v3 = vmul.f32 %v1950_v24, %v944_v59  ;;  %v658_v4 = vmul.f32 %v1935_v11, %v562_v60  ;;  %v373_v7 = vmul.f32 %v1928_v6, %v277_v56 }
 0x101   : > { %v1324_v2 = vmax.f32 %v1229_v58, 0.0  ;;  %v1230_v5 = vadd.f32 %v1953_v28, %v1134_v61  ;;  %v945_v9 = vmax.f32 %v850_v62, 0.0  ;;  %v563_v10 = vmax.f32 %v468_v63, 0.0 }
 0x102   : > { %v851_v12 = vadd.f32 %v1946_v20, %v755_v0  ;;  %v1135_v13 = vadd.f32 %v1040_v3, %v657_v53  ;;  %v469_v14 = vadd.f32 %v1931_v8, %v373_v7  ;;  %v756_v15 = vmul.f32 %v1941_v16, %v277_v56  ;;  %v282_v56 = vld [vmem:[%s1916_s24 + $0x270] sm:$0xff]  ;;  %v283_v7 = vld [vmem:[%s1916_s24 + $0x278] sm:$0xff] }
 0x103   : > { %1419 = vst [vmem:[%s1989_s16 + $0x220] sm:$0xff] %v1324_v2  ;;  %v374_v17 = vmul.f32 %v1928_v6, %v278_v1  ;;  %v1325_v19 = vmax.f32 %v1230_v5, 0.0  ;;  %v1041_v21 = vmul.f32 %v1950_v24, %v945_v9  ;;  %v659_v22 = vmul.f32 %v1935_v11, %v563_v10 }
 0x104   : > { %v946_v23 = vmax.f32 %v851_v12, 0.0  ;;  %v1231_v25 = vadd.f32 %v1953_v28, %v1135_v13  ;;  %v564_v26 = vmax.f32 %v469_v14, 0.0  ;;  %v852_v27 = vadd.f32 %v1946_v20, %v756_v15 }
 0x105   : > { %v470_v29 = vadd.f32 %v1931_v8, %v374_v17  ;;  %1420 = vst [vmem:[%s1989_s16 + $0x228] sm:$0xff] %v1325_v19  ;;  %v1136_v30 = vadd.f32 %v1041_v21, %v658_v4  ;;  %v757_v32 = vmul.f32 %v1941_v16, %v278_v1  ;;  %v375_v33 = vmul.f32 %v1928_v6, %v279_v18 }
 0x106   : > { %v1042_v31 = vmul.f32 %v1950_v24, %v946_v23  ;;  %v1326_v35 = vmax.f32 %v1231_v25, 0.0  ;;  %v660_v36 = vmul.f32 %v1935_v11, %v564_v26  ;;  %v947_v37 = vmax.f32 %v852_v27, 0.0  ;;  %v284_v23 = vld [vmem:[%s1916_s24 + $0x280] sm:$0xff] }
 0x107   : > { %v565_v38 = vmax.f32 %v470_v29, 0.0  ;;  %v1232_v39 = vadd.f32 %v1953_v28, %v1136_v30  ;;  %v853_v41 = vadd.f32 %v1946_v20, %v757_v32  ;;  %v471_v42 = vadd.f32 %v1931_v8, %v375_v33 }
 0x108   : > { %v1137_v40 = vadd.f32 %v1042_v31, %v659_v22  ;;  %1421 = vst [vmem:[%s1989_s16 + $0x230] sm:$0xff] %v1326_v35  ;;  %v1043_v43 = vmul.f32 %v1950_v24, %v947_v37  ;;  %v758_v45 = vmul.f32 %v1941_v16, %v279_v18  ;;  %v376_v46 = vmul.f32 %v1928_v6, %v280_v34 }
 0x109   : > { %v661_v44 = vmul.f32 %v1935_v11, %v565_v38  ;;  %v1327_v48 = vmax.f32 %v1232_v39, 0.0  ;;  %v948_v50 = vmax.f32 %v853_v41, 0.0  ;;  %v566_v51 = vmax.f32 %v471_v42, 0.0  ;;  %v285_v38 = vld [vmem:[%s1916_s24 + $0x288] sm:$0xff] }
 0x10a   : > { %v1233_v49 = vadd.f32 %v1953_v28, %v1137_v40  ;;  %v1138_v52 = vadd.f32 %v1043_v43, %v660_v36  ;;  %v854_v53 = vadd.f32 %v1946_v20, %v758_v45  ;;  %v472_v54 = vadd.f32 %v1931_v8, %v376_v46 }
 0x10b   : > { %v759_v55 = vmul.f32 %v1941_v16, %v280_v34  ;;  %1422 = vst [vmem:[%s1989_s16 + $0x238] sm:$0xff] %v1327_v48  ;;  %v1044_v58 = vmul.f32 %v1950_v24, %v948_v50  ;;  %v662_v59 = vmul.f32 %v1935_v11, %v566_v51  ;;  %v377_v60 = vmul.f32 %v1928_v6, %v281_v47 }
 0x10c   : > { %v1328_v57 = vmax.f32 %v1233_v49, 0.0  ;;  %v1234_v61 = vadd.f32 %v1953_v28, %v1138_v52  ;;  %v949_v62 = vmax.f32 %v854_v53, 0.0  ;;  %v567_v63 = vmax.f32 %v472_v54, 0.0 }
 0x10d   : > { %v855_v0 = vadd.f32 %v1946_v20, %v759_v55  ;;  %v1139_v1 = vadd.f32 %v1044_v58, %v661_v44  ;;  %v473_v2 = vadd.f32 %v1931_v8, %v377_v60  ;;  %v760_v3 = vmul.f32 %v1941_v16, %v281_v47  ;;  %v286_v47 = vld [vmem:[%s1916_s24 + $0x290] sm:$0xff]  ;;  %v287_v60 = vld [vmem:[%s1916_s24 + $0x298] sm:$0xff] }
 0x10e   : > { %1423 = vst [vmem:[%s1989_s16 + $0x240] sm:$0xff] %v1328_v57  ;;  %v378_v4 = vmul.f32 %v1928_v6, %v282_v56  ;;  %v1329_v5 = vmax.f32 %v1234_v61, 0.0  ;;  %v1045_v9 = vmul.f32 %v1950_v24, %v949_v62  ;;  %v663_v10 = vmul.f32 %v1935_v11, %v567_v63 }
 0x10f   : > { %v950_v12 = vmax.f32 %v855_v0, 0.0  ;;  %v1235_v13 = vadd.f32 %v1953_v28, %v1139_v1  ;;  %v568_v14 = vmax.f32 %v473_v2, 0.0  ;;  %v856_v15 = vadd.f32 %v1946_v20, %v760_v3 }
 0x110   : > { %v474_v17 = vadd.f32 %v1931_v8, %v378_v4  ;;  %1424 = vst [vmem:[%s1989_s16 + $0x248] sm:$0xff] %v1329_v5  ;;  %v1140_v18 = vadd.f32 %v1045_v9, %v662_v59  ;;  %v761_v21 = vmul.f32 %v1941_v16, %v282_v56  ;;  %v379_v22 = vmul.f32 %v1928_v6, %v283_v7 }
 0x111   : > { %v1046_v19 = vmul.f32 %v1950_v24, %v950_v12  ;;  %v1330_v25 = vmax.f32 %v1235_v13, 0.0  ;;  %v664_v26 = vmul.f32 %v1935_v11, %v568_v14  ;;  %v951_v27 = vmax.f32 %v856_v15, 0.0  ;;  %v288_v12 = vld [vmem:[%s1916_s24 + $0x2a0] sm:$0xff] }
 0x112   : > { %v569_v29 = vmax.f32 %v474_v17, 0.0  ;;  %v1236_v30 = vadd.f32 %v1953_v28, %v1140_v18  ;;  %v857_v32 = vadd.f32 %v1946_v20, %v761_v21  ;;  %v475_v33 = vadd.f32 %v1931_v8, %v379_v22 }
 0x113   : > { %v1141_v31 = vadd.f32 %v1046_v19, %v663_v10  ;;  %1425 = vst [vmem:[%s1989_s16 + $0x250] sm:$0xff] %v1330_v25  ;;  %v1047_v34 = vmul.f32 %v1950_v24, %v951_v27  ;;  %v762_v36 = vmul.f32 %v1941_v16, %v283_v7  ;;  %v380_v37 = vmul.f32 %v1928_v6, %v284_v23 }
 0x114   : > { %v665_v35 = vmul.f32 %v1935_v11, %v569_v29  ;;  %v1331_v39 = vmax.f32 %v1236_v30, 0.0  ;;  %v952_v41 = vmax.f32 %v857_v32, 0.0  ;;  %v570_v42 = vmax.f32 %v475_v33, 0.0  ;;  %v289_v29 = vld [vmem:[%s1916_s24 + $0x2a8] sm:$0xff] }
 0x115   : > { %v1237_v40 = vadd.f32 %v1953_v28, %v1141_v31  ;;  %v1142_v43 = vadd.f32 %v1047_v34, %v664_v26  ;;  %v858_v44 = vadd.f32 %v1946_v20, %v762_v36  ;;  %v476_v45 = vadd.f32 %v1931_v8, %v380_v37 }
 0x116   : > { %v763_v46 = vmul.f32 %v1941_v16, %v284_v23  ;;  %1426 = vst [vmem:[%s1989_s16 + $0x258] sm:$0xff] %v1331_v39  ;;  %v1048_v49 = vmul.f32 %v1950_v24, %v952_v41  ;;  %v666_v50 = vmul.f32 %v1935_v11, %v570_v42  ;;  %v381_v51 = vmul.f32 %v1928_v6, %v285_v38 }
 0x117   : > { %v1332_v48 = vmax.f32 %v1237_v40, 0.0  ;;  %v1238_v52 = vadd.f32 %v1953_v28, %v1142_v43  ;;  %v953_v53 = vmax.f32 %v858_v44, 0.0  ;;  %v571_v54 = vmax.f32 %v476_v45, 0.0 }
 0x118   : > { %v859_v55 = vadd.f32 %v1946_v20, %v763_v46  ;;  %v1143_v56 = vadd.f32 %v1048_v49, %v665_v35  ;;  %v477_v57 = vadd.f32 %v1931_v8, %v381_v51  ;;  %v764_v58 = vmul.f32 %v1941_v16, %v285_v38  ;;  %v290_v38 = vld [vmem:[%s1916_s24 + $0x2b0] sm:$0xff]  ;;  %v291_v51 = vld [vmem:[%s1916_s24 + $0x2b8] sm:$0xff] }
 0x119   : > { %1427 = vst [vmem:[%s1989_s16 + $0x260] sm:$0xff] %v1332_v48  ;;  %v382_v59 = vmul.f32 %v1928_v6, %v286_v47  ;;  %v1333_v61 = vmax.f32 %v1238_v52, 0.0  ;;  %v1049_v62 = vmul.f32 %v1950_v24, %v953_v53  ;;  %v667_v63 = vmul.f32 %v1935_v11, %v571_v54 }
 0x11a   : > { %v954_v0 = vmax.f32 %v859_v55, 0.0  ;;  %v1239_v1 = vadd.f32 %v1953_v28, %v1143_v56  ;;  %v572_v2 = vmax.f32 %v477_v57, 0.0  ;;  %v860_v3 = vadd.f32 %v1946_v20, %v764_v58 }
 0x11b   : > { %v478_v4 = vadd.f32 %v1931_v8, %v382_v59  ;;  %1428 = vst [vmem:[%s1989_s16 + $0x268] sm:$0xff] %v1333_v61  ;;  %v1144_v7 = vadd.f32 %v1049_v62, %v666_v50  ;;  %v765_v9 = vmul.f32 %v1941_v16, %v286_v47  ;;  %v383_v10 = vmul.f32 %v1928_v6, %v287_v60 }
 0x11c   : > { %v1050_v5 = vmul.f32 %v1950_v24, %v954_v0  ;;  %v1334_v13 = vmax.f32 %v1239_v1, 0.0  ;;  %v668_v14 = vmul.f32 %v1935_v11, %v572_v2  ;;  %v955_v15 = vmax.f32 %v860_v3, 0.0  ;;  %v292_v0 = vld [vmem:[%s1916_s24 + $0x2c0] sm:$0xff] }
 0x11d   : > { %v573_v17 = vmax.f32 %v478_v4, 0.0  ;;  %v1240_v18 = vadd.f32 %v1953_v28, %v1144_v7  ;;  %v861_v21 = vadd.f32 %v1946_v20, %v765_v9  ;;  %v479_v22 = vadd.f32 %v1931_v8, %v383_v10 }
 0x11e   : > { %v1145_v19 = vadd.f32 %v1050_v5, %v667_v63  ;;  %1429 = vst [vmem:[%s1989_s16 + $0x270] sm:$0xff] %v1334_v13  ;;  %v1051_v23 = vmul.f32 %v1950_v24, %v955_v15  ;;  %v766_v26 = vmul.f32 %v1941_v16, %v287_v60  ;;  %v384_v27 = vmul.f32 %v1928_v6, %v288_v12 }
 0x11f   : > { %v669_v25 = vmul.f32 %v1935_v11, %v573_v17  ;;  %v1335_v30 = vmax.f32 %v1240_v18, 0.0  ;;  %v956_v32 = vmax.f32 %v861_v21, 0.0  ;;  %v574_v33 = vmax.f32 %v479_v22, 0.0  ;;  %v293_v17 = vld [vmem:[%s1916_s24 + $0x2c8] sm:$0xff] }
 0x120   : > { %v1241_v31 = vadd.f32 %v1953_v28, %v1145_v19  ;;  %v1146_v34 = vadd.f32 %v1051_v23, %v668_v14  ;;  %v862_v35 = vadd.f32 %v1946_v20, %v766_v26  ;;  %v480_v36 = vadd.f32 %v1931_v8, %v384_v27 }
 0x121   : > { %v767_v37 = vmul.f32 %v1941_v16, %v288_v12  ;;  %1430 = vst [vmem:[%s1989_s16 + $0x278] sm:$0xff] %v1335_v30  ;;  %v1052_v40 = vmul.f32 %v1950_v24, %v956_v32  ;;  %v670_v41 = vmul.f32 %v1935_v11, %v574_v33  ;;  %v385_v42 = vmul.f32 %v1928_v6, %v289_v29 }
 0x122   : > { %v1336_v39 = vmax.f32 %v1241_v31, 0.0  ;;  %v1242_v43 = vadd.f32 %v1953_v28, %v1146_v34  ;;  %v957_v44 = vmax.f32 %v862_v35, 0.0  ;;  %v575_v45 = vmax.f32 %v480_v36, 0.0 }
 0x123   : > { %v863_v46 = vadd.f32 %v1946_v20, %v767_v37  ;;  %v1147_v47 = vadd.f32 %v1052_v40, %v669_v25  ;;  %v481_v48 = vadd.f32 %v1931_v8, %v385_v42  ;;  %v768_v49 = vmul.f32 %v1941_v16, %v289_v29  ;;  %v294_v29 = vld [vmem:[%s1916_s24 + $0x2d0] sm:$0xff]  ;;  %v295_v42 = vld [vmem:[%s1916_s24 + $0x2d8] sm:$0xff] }
 0x124   : > { %1431 = vst [vmem:[%s1989_s16 + $0x280] sm:$0xff] %v1336_v39  ;;  %v386_v50 = vmul.f32 %v1928_v6, %v290_v38  ;;  %v1337_v52 = vmax.f32 %v1242_v43, 0.0  ;;  %v1053_v53 = vmul.f32 %v1950_v24, %v957_v44  ;;  %v671_v54 = vmul.f32 %v1935_v11, %v575_v45 }
 0x125   : > { %v958_v55 = vmax.f32 %v863_v46, 0.0  ;;  %v1243_v56 = vadd.f32 %v1953_v28, %v1147_v47  ;;  %v576_v57 = vmax.f32 %v481_v48, 0.0  ;;  %v864_v58 = vadd.f32 %v1946_v20, %v768_v49 }
 0x126   : > { %v482_v59 = vadd.f32 %v1931_v8, %v386_v50  ;;  %1432 = vst [vmem:[%s1989_s16 + $0x288] sm:$0xff] %v1337_v52  ;;  %v1148_v60 = vadd.f32 %v1053_v53, %v670_v41  ;;  %v769_v62 = vmul.f32 %v1941_v16, %v290_v38  ;;  %v387_v63 = vmul.f32 %v1928_v6, %v291_v51 }
 0x127   : > { %v1054_v61 = vmul.f32 %v1950_v24, %v958_v55  ;;  %v1338_v1 = vmax.f32 %v1243_v56, 0.0  ;;  %v672_v2 = vmul.f32 %v1935_v11, %v576_v57  ;;  %v959_v3 = vmax.f32 %v864_v58, 0.0  ;;  %v296_v55 = vld [vmem:[%s1916_s24 + $0x2e0] sm:$0xff] }
 0x128   : > { %v577_v4 = vmax.f32 %v482_v59, 0.0  ;;  %v1244_v7 = vadd.f32 %v1953_v28, %v1148_v60  ;;  %v865_v9 = vadd.f32 %v1946_v20, %v769_v62  ;;  %v483_v10 = vadd.f32 %v1931_v8, %v387_v63 }
 0x129   : > { %v1149_v5 = vadd.f32 %v1054_v61, %v671_v54  ;;  %1433 = vst [vmem:[%s1989_s16 + $0x290] sm:$0xff] %v1338_v1  ;;  %v1055_v12 = vmul.f32 %v1950_v24, %v959_v3  ;;  %v770_v14 = vmul.f32 %v1941_v16, %v291_v51  ;;  %v388_v15 = vmul.f32 %v1928_v6, %v292_v0 }
 0x12a   : > { %v673_v13 = vmul.f32 %v1935_v11, %v577_v4  ;;  %v1339_v18 = vmax.f32 %v1244_v7, 0.0  ;;  %v960_v21 = vmax.f32 %v865_v9, 0.0  ;;  %v578_v22 = vmax.f32 %v483_v10, 0.0  ;;  %v297_v4 = vld [vmem:[%s1916_s24 + $0x2e8] sm:$0xff] }
 0x12b   : > { %v1245_v19 = vadd.f32 %v1953_v28, %v1149_v5  ;;  %v1150_v23 = vadd.f32 %v1055_v12, %v672_v2  ;;  %v866_v25 = vadd.f32 %v1946_v20, %v770_v14  ;;  %v484_v26 = vadd.f32 %v1931_v8, %v388_v15 }
 0x12c   : > { %v771_v27 = vmul.f32 %v1941_v16, %v292_v0  ;;  %1434 = vst [vmem:[%s1989_s16 + $0x298] sm:$0xff] %v1339_v18  ;;  %v1056_v31 = vmul.f32 %v1950_v24, %v960_v21  ;;  %v674_v32 = vmul.f32 %v1935_v11, %v578_v22  ;;  %v389_v33 = vmul.f32 %v1928_v6, %v293_v17 }
 0x12d   : > { %v1340_v30 = vmax.f32 %v1245_v19, 0.0  ;;  %v1246_v34 = vadd.f32 %v1953_v28, %v1150_v23  ;;  %v961_v35 = vmax.f32 %v866_v25, 0.0  ;;  %v579_v36 = vmax.f32 %v484_v26, 0.0 }
 0x12e   : > { %v867_v37 = vadd.f32 %v1946_v20, %v771_v27  ;;  %v1151_v38 = vadd.f32 %v1056_v31, %v673_v13  ;;  %v485_v39 = vadd.f32 %v1931_v8, %v389_v33  ;;  %v772_v40 = vmul.f32 %v1941_v16, %v293_v17  ;;  %v298_v17 = vld [vmem:[%s1916_s24 + $0x2f0] sm:$0xff]  ;;  %s1707_s24 = scalar_lea.vmem %s1706_s4, 24320 }
 0x12f   : > { %1435 = vst [vmem:[%s1989_s16 + $0x2a0] sm:$0xff] %v1340_v30  ;;  %v390_v41 = vmul.f32 %v1928_v6, %v294_v29  ;;  %v1341_v43 = vmax.f32 %v1246_v34, 0.0  ;;  %v1057_v44 = vmul.f32 %v1950_v24, %v961_v35  ;;  %v675_v45 = vmul.f32 %v1935_v11, %v579_v36  ;;  %p1709_p13 = scmp.lt.s32.totalorder %s1707_s24, %s1701_s17 }
 0x130   : > { %v962_v46 = vmax.f32 %v867_v37, 0.0  ;;  %v1247_v47 = vadd.f32 %v1953_v28, %v1151_v38  ;;  %v580_v48 = vmax.f32 %v485_v39, 0.0  ;;  %v868_v49 = vadd.f32 %v1946_v20, %v772_v40 }
 0x131   : > { %v486_v50 = vadd.f32 %v1931_v8, %v390_v41  ;;  %1436 = vst [vmem:[%s1989_s16 + $0x2a8] sm:$0xff] %v1341_v43  ;;  %v1152_v51 = vadd.f32 %v1057_v44, %v674_v32  ;;  %v773_v53 = vmul.f32 %v1941_v16, %v294_v29  ;;  %v391_v54 = vmul.f32 %v1928_v6, %v295_v42  ;;  %p1710_p2 = por %p1709_p13, %p1708_p12 }
 0x132   : > { %v1058_v52 = vmul.f32 %v1950_v24, %v962_v46  ;;  %v1342_v56 = vmax.f32 %v1247_v47, 0.0  ;;  %v676_v57 = vmul.f32 %v1935_v11, %v580_v48  ;;  %v963_v58 = vmax.f32 %v868_v49, 0.0 }
 0x133   : > { %v581_v59 = vmax.f32 %v486_v50, 0.0  ;;  %v1248_v60 = vadd.f32 %v1953_v28, %v1152_v51  ;;  %v869_v62 = vadd.f32 %v1946_v20, %v773_v53  ;;  %v487_v63 = vadd.f32 %v1931_v8, %v391_v54  ;;  %p1711_p5 = pnand %p1710_p2, %p1704_p9 }
 0x134   : > { %v1153_v61 = vadd.f32 %v1058_v52, %v675_v45  ;;  %1437 = vst [vmem:[%s1989_s16 + $0x2b0] sm:$0xff] %v1342_v56  ;;  %v1059_v0 = vmul.f32 %v1950_v24, %v963_v58  ;;  %v774_v2 = vmul.f32 %v1941_v16, %v295_v42  ;;  %v392_v3 = vmul.f32 %v1928_v6, %v296_v55 }
 0x135   : > { %v677_v1 = vmul.f32 %v1935_v11, %v581_v59  ;;  %v1343_v7 = vmax.f32 %v1248_v60, 0.0  ;;  %v964_v9 = vmax.f32 %v869_v62, 0.0  ;;  %v582_v10 = vmax.f32 %v487_v63, 0.0 }
 0x136   : > { %v1249_v5 = vadd.f32 %v1953_v28, %v1153_v61  ;;  %v1154_v12 = vadd.f32 %v1059_v0, %v676_v57  ;;  %v870_v13 = vadd.f32 %v1946_v20, %v774_v2  ;;  %v488_v14 = vadd.f32 %v1931_v8, %v392_v3 }
 0x137   : > { %v775_v15 = vmul.f32 %v1941_v16, %v296_v55  ;;  %1438 = vst [vmem:[%s1989_s16 + $0x2b8] sm:$0xff] %v1343_v7  ;;  %v1060_v19 = vmul.f32 %v1950_v24, %v964_v9  ;;  %v678_v21 = vmul.f32 %v1935_v11, %v582_v10  ;;  %v393_v22 = vmul.f32 %v1928_v6, %v297_v4 }
 0x138   : > { %v1344_v18 = vmax.f32 %v1249_v5, 0.0  ;;  %v1250_v23 = vadd.f32 %v1953_v28, %v1154_v12  ;;  %v965_v25 = vmax.f32 %v870_v13, 0.0  ;;  %v583_v26 = vmax.f32 %v488_v14, 0.0 }
 0x139   : > { %v871_v27 = vadd.f32 %v1946_v20, %v775_v15  ;;  %v1155_v29 = vadd.f32 %v1060_v19, %v677_v1  ;;  %v489_v30 = vadd.f32 %v1931_v8, %v393_v22  ;;  %v776_v31 = vmul.f32 %v1941_v16, %v297_v4 }
 0x13a   : > { %1439 = vst [vmem:[%s1989_s16 + $0x2c0] sm:$0xff] %v1344_v18  ;;  %v394_v32 = vmul.f32 %v1928_v6, %v298_v17  ;;  %v1345_v33 = vmax.f32 %v1250_v23, 0.0  ;;  %v1061_v34 = vmul.f32 %v1950_v24, %v965_v25  ;;  %v679_v35 = vmul.f32 %v1935_v11, %v583_v26 }
 0x13b   : > { %v966_v36 = vmax.f32 %v871_v27, 0.0  ;;  %v1251_v37 = vadd.f32 %v1953_v28, %v1155_v29  ;;  %v584_v38 = vmax.f32 %v489_v30, 0.0  ;;  %v872_v39 = vadd.f32 %v1946_v20, %v776_v31 }
 0x13c   : > { %v490_v40 = vadd.f32 %v1931_v8, %v394_v32  ;;  %1440 = vst [vmem:[%s1989_s16 + $0x2c8] sm:$0xff] %v1345_v33  ;;  %v1156_v41 = vadd.f32 %v1061_v34, %v678_v21  ;;  %v777_v6 = vmul.f32 %v1941_v16, %v298_v17 }
 0x13d   : > { %v1062_v42 = vmul.f32 %v1950_v24, %v966_v36  ;;  %v1346_v43 = vmax.f32 %v1251_v37, 0.0  ;;  %v680_v44 = vmul.f32 %v1935_v11, %v584_v38  ;;  %v967_v45 = vmax.f32 %v872_v39, 0.0 }
 0x13e   : > { %v585_v46 = vmax.f32 %v490_v40, 0.0  ;;  %v1252_v47 = vadd.f32 %v1953_v28, %v1156_v41  ;;  %v873_v8 = vadd.f32 %v1946_v20, %v777_v6 }
 0x13f   : > { %v1157_v48 = vadd.f32 %v1062_v42, %v679_v35  ;;  %1441 = vst [vmem:[%s1989_s16 + $0x2d0] sm:$0xff] %v1346_v43  ;;  %v1063_v49 = vmul.f32 %v1950_v24, %v967_v45 }
 0x140   : > { %v1347_v50 = vmax.f32 %v1252_v47, 0.0  ;;  %v681_v51 = vmul.f32 %v1935_v11, %v585_v46  ;;  %v968_v52 = vmax.f32 %v873_v8, 0.0 }
 0x141   : > { %v1253_v16 = vadd.f32 %v1953_v28, %v1157_v48  ;;  %v1158_v53 = vadd.f32 %v1063_v49, %v680_v44 }
 0x142   : > { %1442 = vst [vmem:[%s1989_s16 + $0x2d8] sm:$0xff] %v1347_v50  ;;  %v1064_v55 = vmul.f32 %v1950_v24, %v968_v52 }
 0x143   : > { %v1348_v54 = vmax.f32 %v1253_v16, 0.0  ;;  %v1254_v20 = vadd.f32 %v1953_v28, %v1158_v53 }
 0x144   : > { %v1159_v56 = vadd.f32 %v1064_v55, %v681_v51 }
 0x145   : > { %1443 = vst [vmem:[%s1989_s16 + $0x2e0] sm:$0xff] %v1348_v54  ;;  %v1349_v57 = vmax.f32 %v1254_v20, 0.0 }
 0x146   : > { %v1255_v58 = vadd.f32 %v1953_v28, %v1159_v56 }
 0x147   : > { %1444 = vst [vmem:[%s1989_s16 + $0x2e8] sm:$0xff] %v1349_v57 }
 0x148   : > { %v1350_v11 = vmax.f32 %v1255_v58, 0.0 }
 0x14a   : > { %1445 = vst [vmem:[%s1989_s16 + $0x2f0] sm:$0xff] %v1350_v11 }
 0x14b   : > { %1714 = shalt.err (!%p1711_p5)
}
 0x14c   : > { %s1715_s18 = scalar_lea.hbm %s2799_s30, 12160  ;;  %s1719_s6 = scalar_lea.hbm %s2852_s2, 24320 }
 0x14d   : > { %p1716_p10 = scmp.ne.s32.totalorder %s2799_s30, %s1715_s18  ;;  %p1720_p0 = scmp.lt.s32.totalorder %s2799_s30, %s2852_s2 }
 0x14e   : > { %p1721_p4 = scmp.lt.s32.totalorder %s1719_s6, %s1715_s18 }
 0x14f   : > { %p1717_p11 = pnand %p1716_p10, %p1857_p8 }
 0x150   : > { %p1722_p6 = por %p1721_p4, %p1720_p0 }
 0x151   : > { %p1718_p1 = pneg %p1717_p11 }
 0x153   : > { %p1723_p3 = pnand %p1722_p6, %p1718_p1 }
 0x155   : > { %1726 = shalt.err (!%p1723_p3)
}
 0x156   : > { %s1792_s19 = smov 640   ;;  %s1793_s16 = smov 40  }
 0x157   : > { %1589 = dma.vmem_to_hbm [thread:$0]  (%p1857_p8), %s2801_s28, 12160, %s2799_s30, %s1447_s12, %s1792_s19, %s1792_s19, %s1793_s16  }
 0x158 PF: > { %s1478_s27 = sand.u32 1, %s1765_s9   ;;  %p2859_p7 = scmp.ne.s32.totalorder %s2856_s21, 0 }
 0x159   : > { %p2860_p9 = scmp.ge.s32.totalorder %s1785_s14, 2  ;;  %s1479_s29 = scalar_lea.sflag [#allocation4], %s1478_s27 }
 0x15b   : > { %p1600_p12 = pnand %p2860_p9, %p2859_p7 }
 0x15d   : > { %p1601_p13 = pneg %p1600_p12 }
 0x15f   : > { %1760 = dma.done.wait (%p1601_p13), %s1479_s29, 12160  }
 0x160   : > { %1762 = vsyncadd (%p1601_p13), %s1479_s29, 4294955136  ;;  %s19_s14 = sadd.s32 1, %s1785_s14   ;;  %s2861_s9 = smov %s1769_s10 }
 0x161   : > { %p16_p2 = scmp.ge.s32.totalorder %s19_s14, 4   ;;  %s2862_s10 = smov %s1773_s11 }
 0x162   : > { %s2863_s11 = smov %s1897_s15  ;;  %s2864_s12 = smov %s1781_s13 }
 0x163   : > { %s2865_s13 = smov %s2867_s25  ;;  %18 = sbr.rel (!%p16_p2) target bundleno = 7 (0x7), region = 78 }
 0x168   :  { %1484 = vsyncpa [#allocation3], 1 }
 0x169   :  { %1486 = vsyncpa [#allocation3 + $0x1], 1 }
 0x16a   :  { %1487 = vsyncpa [#allocation4], 1 }
 0x16b   :  { %1489 = vsyncpa [#allocation4 + $0x1], 1 }
 0x16c   :  { %1490 = vsyncpa [#allocation5], 1 }
 0x16d   :  { %1492 = vsyncpa [#allocation5 + $0x1], 1 }

</bundles_post_ra>
